<compile_context>
chip_gen: v7x
topology: tpu7x:2x2x1
jax: 0.10.0
libtpu: 0.0.40
codegen_flags: <defaults>
</compile_context>

<pallas_src>
import functools

import jax
import jax.numpy as jnp
from jax.experimental import pallas as pl
from jax.experimental.pallas import tpu as pltpu


def _contained_lstm_kernel(x2_ref, mask_ref, w_ih_ref, w_hh_ref, b_ref, out_ref,
                           *, lnorm, eps):
    # Shapes (static): x2 (B*S, I), mask (B, S), w_ih (I, 4H), w_hh (H, 4H), b (1, 4H).
    B, S = mask_ref.shape
    H = out_ref.shape[-1]
    G = 4 * H

    w_ih = w_ih_ref[...]          # (I, 4H)  gate order [i, f, o, g]
    w_hh = w_hh_ref[...]          # (H, 4H)  LayerNorm scale already folded in
    b = b_ref[...]                # (1, 4H)  bias_ih + bias_hh (+ ln_b @ W_hh) folded in

    # ---- (1) hoisted input projection: one big MXU matmul, off the serial chain ----
    x_proj = jnp.dot(x2_ref[...], w_ih, preferred_element_type=jnp.float32) + b   # (B*S, 4H)
    x_proj = x_proj.reshape(B, S, G)

    # ---- (4) mask compare hoisted out of the recurrence ----
    ended = mask_ref[...] > 0.5    # (B, S) bool; True => sequence already ended

    h = jnp.zeros((B, H), jnp.float32)
    c = jnp.zeros((B, H), jnp.float32)
    out = jnp.zeros((B, H), jnp.float32)

    for t in range(S):             # (5) static unroll; S is small
        if lnorm:
            # ---- (2) only normalize; affine (ln_w, ln_b) is folded into w_hh / b ----
            mu = jnp.mean(h, axis=-1, keepdims=True)
            var = jnp.mean((h - mu) ** 2, axis=-1, keepdims=True)
            h_in = (h - mu) * jax.lax.rsqrt(var + eps)
        else:
            h_in = h

        # Single dependent matmul per step.
        gates = x_proj[:, t, :] + jnp.dot(h_in, w_hh,
                                          preferred_element_type=jnp.float32)  # (B, 4H)

        # ---- (3) gate order [i, f, o, g]: one 3H sigmoid + one H tanh ----
        sg = jax.nn.sigmoid(gates[:, :3 * H])
        g_g = jnp.tanh(gates[:, 3 * H:])
        i_g = sg[:, 0 * H:1 * H]
        f_g = sg[:, 1 * H:2 * H]
        o_g = sg[:, 2 * H:3 * H]

        c = f_g * c + i_g * g_g
        h = o_g * jnp.tanh(c)

        # torch: output[~mask[:, t]] = h[~mask[:, t]]  (only update where not ended)
        out = jnp.where(ended[:, t][:, None], out, h)

    out_ref[...] = out


def contained_lstm_forward(x, mask, w_ih_t, w_hh_t, bias, ln_w, ln_b,
                           *, lnorm=True, eps=1e-5):
    """x: (B,S,I) f32, mask: (B,S) f32 (1.0 => ended). Returns (B,H) f32.

    w_ih_t: (I,4H), w_hh_t: (H,4H), bias: (4H,) -- torch gate order [i,f,g,o].
    """
    B, S, I = x.shape
    H = w_hh_t.shape[0]

    # (3) Reorder gate columns [i, f, g, o] -> [i, f, o, g] so in-kernel transcendentals
    # cover contiguous lane blocks.
    def reorder_gates(a):
        i, f, g, o = jnp.split(a, 4, axis=-1)
        return jnp.concatenate([i, f, o, g], axis=-1)

    w_ih_k = reorder_gates(w_ih_t)           # (I, 4H)
    w_hh_r = reorder_gates(w_hh_t)           # (H, 4H)
    bias_r = reorder_gates(bias)             # (4H,)

    # (2) Fold LayerNorm affine into the recurrent weights:
    #     (hn * ln_w + ln_b) @ W_hh == hn @ (ln_w[:,None] * W_hh) + ln_b @ W_hh
    if lnorm:
        w_hh_k = ln_w[:, None] * w_hh_r
        bias_k = bias_r + ln_b @ w_hh_r
    else:
        w_hh_k = w_hh_r
        bias_k = bias_r

    kernel = functools.partial(_contained_lstm_kernel, lnorm=lnorm, eps=eps)
    return pl.pallas_call(
        kernel,
        out_shape=jax.ShapeDtypeStruct((B, H), jnp.float32),
        # Everything fits trivially in VMEM at these sizes -> single invocation, no grid.
        in_specs=[pl.BlockSpec(memory_space=pltpu.MemorySpace.VMEM)] * 5,
        out_specs=pl.BlockSpec(memory_space=pltpu.MemorySpace.VMEM),
    )(x.reshape(B * S, I), mask, w_ih_k, w_hh_k, bias_k.reshape(1, 4 * H))


def contained_lstm_reference(x, mask, w_ih_t, w_hh_t, bias, ln_w, ln_b,
                             *, lnorm=True, eps=1e-5):
    """Pure-JAX reference mirroring the torch module semantics (unfused, torch gate order)."""
    B, S, I = x.shape
    H = w_hh_t.shape[0]
    h = jnp.zeros((B, H), jnp.float32)
    c = jnp.zeros((B, H), jnp.float32)
    out = jnp.zeros((B, H), jnp.float32)
    for t in range(S):
        if lnorm:
            mu = jnp.mean(h, axis=-1, keepdims=True)
            var = jnp.mean((h - mu) ** 2, axis=-1, keepdims=True)
            h_in = (h - mu) / jnp.sqrt(var + eps) * ln_w[None, :] + ln_b[None, :]
        else:
            h_in = h
        gates = x[:, t] @ w_ih_t + h_in @ w_hh_t + bias[None, :]
        i_g = jax.nn.sigmoid(gates[:, 0 * H:1 * H])
        f_g = jax.nn.sigmoid(gates[:, 1 * H:2 * H])
        g_g = jnp.tanh(gates[:, 2 * H:3 * H])
        o_g = jax.nn.sigmoid(gates[:, 3 * H:4 * H])
        c = f_g * c + i_g * g_g
        h = o_g * jnp.tanh(c)
        ended = mask[:, t][:, None] > 0.5
        out = jnp.where(ended, out, h)
    return out


if __name__ == "__main__":
    # Small shapes consistent with the module's forward: x (B, S, I) -> out (B, H).
    B, S, I, H = 2, 8, 16, 32

    key = jax.random.PRNGKey(0)
    k_x, k_wih, k_whh, k_bih, k_bhh, k_len = jax.random.split(key, 6)

    # torch.nn.LSTMCell init: uniform(-1/sqrt(H), 1/sqrt(H)); LayerNorm: weight=1, bias=0.
    bound = 1.0 / (H ** 0.5)
    w_ih = jax.random.uniform(k_wih, (4 * H, I), jnp.float32, -bound, bound)   # torch layout (4H, I)
    w_hh = jax.random.uniform(k_whh, (4 * H, H), jnp.float32, -bound, bound)   # torch layout (4H, H)
    b_ih = jax.random.uniform(k_bih, (4 * H,), jnp.float32, -bound, bound)
    b_hh = jax.random.uniform(k_bhh, (4 * H,), jnp.float32, -bound, bound)
    bias = b_ih + b_hh
    ln_w = jnp.ones((H,), jnp.float32)
    ln_b = jnp.zeros((H,), jnp.float32)

    # Pre-transpose for the kernel (gates computed as x @ W_ih^T, h @ W_hh^T).
    w_ih_t = w_ih.T  # (I, 4H)
    w_hh_t = w_hh.T  # (H, 4H)

    x = jax.random.normal(k_x, (B, S, I), jnp.float32)
    # mask[b, t] == 1.0 means "sequence ended at/before step t" -> don't update output.
    lengths = jax.random.randint(k_len, (B,), 3, S + 1)
    mask = (jnp.arange(S)[None, :] >= lengths[:, None]).astype(jnp.float32)

    out = contained_lstm_forward(x, mask, w_ih_t, w_hh_t, bias, ln_w, ln_b)
    out = jax.block_until_ready(out)

    ref = contained_lstm_reference(x, mask, w_ih_t, w_hh_t, bias, ln_w, ln_b)
    assert out.shape == (B, H)
    # Slightly relaxed tolerance: folding the LayerNorm affine into W_hh/bias changes f32
    # rounding (mathematically identical).
    assert jnp.allclose(out, ref, atol=1e-4, rtol=1e-4), "mismatch vs pure-JAX reference"

    print("KERNEL_OK")
</pallas_src>

<mosaic_0001>
module attributes {stable_mosaic.version = 11 : i64} {
  func.func @_contained_lstm_kernel(%arg0: memref<16x16xf32, #tpu.memory_space<vmem>>, %arg1: memref<2x8xf32, #tpu.memory_space<vmem>>, %arg2: memref<16x128xf32, #tpu.memory_space<vmem>>, %arg3: memref<32x128xf32, #tpu.memory_space<vmem>>, %arg4: memref<1x128xf32, #tpu.memory_space<vmem>>, %arg5: memref<2x32xf32, #tpu.memory_space<vmem>>) attributes {dimension_semantics = [], scalar_prefetch = 0 : i64, scratch_operands = 0 : i64, tpu.core_type = #tpu.core_type<tc>} {
    %c0 = arith.constant 0 : index
    %c0_0 = arith.constant 0 : index
    %0 = vector.load %arg2[%c0, %c0_0] : memref<16x128xf32, #tpu.memory_space<vmem>>, vector<16x128xf32>
    %c0_1 = arith.constant 0 : index
    %c0_2 = arith.constant 0 : index
    %1 = vector.load %arg3[%c0_1, %c0_2] : memref<32x128xf32, #tpu.memory_space<vmem>>, vector<32x128xf32>
    %c0_3 = arith.constant 0 : index
    %c0_4 = arith.constant 0 : index
    %2 = vector.load %arg4[%c0_3, %c0_4] : memref<1x128xf32, #tpu.memory_space<vmem>>, vector<1x128xf32>
    %c0_5 = arith.constant 0 : index
    %c0_6 = arith.constant 0 : index
    %3 = vector.load %arg0[%c0_5, %c0_6] : memref<16x16xf32, #tpu.memory_space<vmem>>, vector<16x16xf32>
    %cst = arith.constant dense<0.000000e+00> : vector<16x128xf32>
    %4 = tpu.matmul %3, %0, %cst {dimension_numbers = #tpu.dot_dimension_numbers<[1], [0], [0], [1], [0, 0, 1, 1], [], []>} : vector<16x16xf32>, vector<16x128xf32>, vector<16x128xf32> -> vector<16x128xf32>
    %5 = vector.broadcast %2 : vector<1x128xf32> to vector<16x128xf32>
    %6 = arith.addf %4, %5 : vector<16x128xf32>
    %7 = vector.shape_cast %6 : vector<16x128xf32> to vector<2x8x128xf32>
    %c0_7 = arith.constant 0 : index
    %c0_8 = arith.constant 0 : index
    %8 = vector.load %arg1[%c0_7, %c0_8] : memref<2x8xf32, #tpu.memory_space<vmem>>, vector<2x8xf32>
    %cst_9 = arith.constant 5.000000e-01 : f32
    %9 = vector.broadcast %cst_9 : f32 to vector<2x8xf32>
    %10 = arith.cmpf ogt, %8, %9 : vector<2x8xf32>
    %cst_10 = arith.constant 0.000000e+00 : f32
    %11 = vector.broadcast %cst_10 : f32 to vector<2x32xf32>
    %cst_11 = arith.constant 0.000000e+00 : f32
    %12 = vector.broadcast %cst_11 : f32 to vector<2x32xf32>
    %cst_12 = arith.constant 0.000000e+00 : f32
    %13 = vector.broadcast %cst_12 : f32 to vector<2x32xf32>
    %cst_13 = arith.constant dense<0.000000e+00> : vector<2xf32>
    %14 = vector.multi_reduction <add>, %11, %cst_13 [1] : vector<2x32xf32> to vector<2xf32>
    %15 = vector.shape_cast %14 : vector<2xf32> to vector<2x1xf32>
    %cst_14 = arith.constant 3.200000e+01 : f32
    %16 = vector.broadcast %cst_14 : f32 to vector<2x1xf32>
    %17 = arith.divf %15, %16 : vector<2x1xf32>
    %18 = vector.broadcast %17 : vector<2x1xf32> to vector<2x32xf32>
    %19 = arith.subf %11, %18 : vector<2x32xf32>
    %20 = arith.mulf %19, %19 : vector<2x32xf32>
    %cst_15 = arith.constant dense<0.000000e+00> : vector<2xf32>
    %21 = vector.multi_reduction <add>, %20, %cst_15 [1] : vector<2x32xf32> to vector<2xf32>
    %22 = vector.shape_cast %21 : vector<2xf32> to vector<2x1xf32>
    %cst_16 = arith.constant 3.200000e+01 : f32
    %23 = vector.broadcast %cst_16 : f32 to vector<2x1xf32>
    %24 = arith.divf %22, %23 : vector<2x1xf32>
    %25 = vector.broadcast %17 : vector<2x1xf32> to vector<2x32xf32>
    %26 = arith.subf %11, %25 : vector<2x32xf32>
    %cst_17 = arith.constant 9.99999974E-6 : f32
    %27 = vector.broadcast %cst_17 : f32 to vector<2x1xf32>
    %28 = arith.addf %24, %27 : vector<2x1xf32>
    %29 = math.rsqrt %28 : vector<2x1xf32>
    %30 = vector.broadcast %29 : vector<2x1xf32> to vector<2x32xf32>
    %31 = arith.mulf %26, %30 : vector<2x32xf32>
    %32 = vector.extract_strided_slice %7 {offsets = [0, 0, 0], sizes = [2, 1, 128], strides = [1, 1, 1]} : vector<2x8x128xf32> to vector<2x1x128xf32>
    %33 = vector.shape_cast %32 : vector<2x1x128xf32> to vector<2x128xf32>
    %cst_18 = arith.constant dense<0.000000e+00> : vector<2x128xf32>
    %34 = tpu.matmul %31, %1, %cst_18 {dimension_numbers = #tpu.dot_dimension_numbers<[1], [0], [0], [1], [0, 0, 1, 1], [], []>} : vector<2x32xf32>, vector<32x128xf32>, vector<2x128xf32> -> vector<2x128xf32>
    %35 = arith.addf %33, %34 : vector<2x128xf32>
    %36 = vector.extract_strided_slice %35 {offsets = [0, 0], sizes = [2, 96], strides = [1, 1]} : vector<2x128xf32> to vector<2x96xf32>
    %37 = arith.negf %36 : vector<2x96xf32>
    %38 = math.exp %37 : vector<2x96xf32>
    %cst_19 = arith.constant 1.000000e+00 : f32
    %39 = vector.broadcast %cst_19 : f32 to vector<2x96xf32>
    %40 = arith.addf %39, %38 : vector<2x96xf32>
    %41 = arith.divf %39, %40 : vector<2x96xf32>
    %42 = vector.extract_strided_slice %35 {offsets = [0, 96], sizes = [2, 32], strides = [1, 1]} : vector<2x128xf32> to vector<2x32xf32>
    %43 = math.tanh %42 : vector<2x32xf32>
    %44 = vector.extract_strided_slice %41 {offsets = [0, 0], sizes = [2, 32], strides = [1, 1]} : vector<2x96xf32> to vector<2x32xf32>
    %45 = vector.extract_strided_slice %41 {offsets = [0, 32], sizes = [2, 32], strides = [1, 1]} : vector<2x96xf32> to vector<2x32xf32>
    %46 = vector.extract_strided_slice %41 {offsets = [0, 64], sizes = [2, 32], strides = [1, 1]} : vector<2x96xf32> to vector<2x32xf32>
    %47 = arith.mulf %45, %12 : vector<2x32xf32>
    %48 = arith.mulf %44, %43 : vector<2x32xf32>
    %49 = arith.addf %47, %48 : vector<2x32xf32>
    %50 = math.tanh %49 : vector<2x32xf32>
    %51 = arith.mulf %46, %50 : vector<2x32xf32>
    %52 = vector.extract_strided_slice %10 {offsets = [0, 0], sizes = [2, 1], strides = [1, 1]} : vector<2x8xi1> to vector<2x1xi1>
    %53 = vector.shape_cast %52 : vector<2x1xi1> to vector<2xi1>
    %54 = vector.shape_cast %53 : vector<2xi1> to vector<2x1xi1>
    %55 = vector.shape_cast %54 : vector<2x1xi1> to vector<2x1xi1>
    %56 = vector.broadcast %55 : vector<2x1xi1> to vector<2x32xi1>
    %57 = arith.select %56, %13, %51 : vector<2x32xi1>, vector<2x32xf32>
    %cst_20 = arith.constant dense<0.000000e+00> : vector<2xf32>
    %58 = vector.multi_reduction <add>, %51, %cst_20 [1] : vector<2x32xf32> to vector<2xf32>
    %59 = vector.shape_cast %58 : vector<2xf32> to vector<2x1xf32>
    %cst_21 = arith.constant 3.200000e+01 : f32
    %60 = vector.broadcast %cst_21 : f32 to vector<2x1xf32>
    %61 = arith.divf %59, %60 : vector<2x1xf32>
    %62 = vector.broadcast %61 : vector<2x1xf32> to vector<2x32xf32>
    %63 = arith.subf %51, %62 : vector<2x32xf32>
    %64 = arith.mulf %63, %63 : vector<2x32xf32>
    %cst_22 = arith.constant dense<0.000000e+00> : vector<2xf32>
    %65 = vector.multi_reduction <add>, %64, %cst_22 [1] : vector<2x32xf32> to vector<2xf32>
    %66 = vector.shape_cast %65 : vector<2xf32> to vector<2x1xf32>
    %cst_23 = arith.constant 3.200000e+01 : f32
    %67 = vector.broadcast %cst_23 : f32 to vector<2x1xf32>
    %68 = arith.divf %66, %67 : vector<2x1xf32>
    %69 = vector.broadcast %61 : vector<2x1xf32> to vector<2x32xf32>
    %70 = arith.subf %51, %69 : vector<2x32xf32>
    %cst_24 = arith.constant 9.99999974E-6 : f32
    %71 = vector.broadcast %cst_24 : f32 to vector<2x1xf32>
    %72 = arith.addf %68, %71 : vector<2x1xf32>
    %73 = math.rsqrt %72 : vector<2x1xf32>
    %74 = vector.broadcast %73 : vector<2x1xf32> to vector<2x32xf32>
    %75 = arith.mulf %70, %74 : vector<2x32xf32>
    %76 = vector.extract_strided_slice %7 {offsets = [0, 1, 0], sizes = [2, 1, 128], strides = [1, 1, 1]} : vector<2x8x128xf32> to vector<2x1x128xf32>
    %77 = vector.shape_cast %76 : vector<2x1x128xf32> to vector<2x128xf32>
    %cst_25 = arith.constant dense<0.000000e+00> : vector<2x128xf32>
    %78 = tpu.matmul %75, %1, %cst_25 {dimension_numbers = #tpu.dot_dimension_numbers<[1], [0], [0], [1], [0, 0, 1, 1], [], []>} : vector<2x32xf32>, vector<32x128xf32>, vector<2x128xf32> -> vector<2x128xf32>
    %79 = arith.addf %77, %78 : vector<2x128xf32>
    %80 = vector.extract_strided_slice %79 {offsets = [0, 0], sizes = [2, 96], strides = [1, 1]} : vector<2x128xf32> to vector<2x96xf32>
    %81 = arith.negf %80 : vector<2x96xf32>
    %82 = math.exp %81 : vector<2x96xf32>
    %cst_26 = arith.constant 1.000000e+00 : f32
    %83 = vector.broadcast %cst_26 : f32 to vector<2x96xf32>
    %84 = arith.addf %83, %82 : vector<2x96xf32>
    %85 = arith.divf %83, %84 : vector<2x96xf32>
    %86 = vector.extract_strided_slice %79 {offsets = [0, 96], sizes = [2, 32], strides = [1, 1]} : vector<2x128xf32> to vector<2x32xf32>
    %87 = math.tanh %86 : vector<2x32xf32>
    %88 = vector.extract_strided_slice %85 {offsets = [0, 0], sizes = [2, 32], strides = [1, 1]} : vector<2x96xf32> to vector<2x32xf32>
    %89 = vector.extract_strided_slice %85 {offsets = [0, 32], sizes = [2, 32], strides = [1, 1]} : vector<2x96xf32> to vector<2x32xf32>
    %90 = vector.extract_strided_slice %85 {offsets = [0, 64], sizes = [2, 32], strides = [1, 1]} : vector<2x96xf32> to vector<2x32xf32>
    %91 = arith.mulf %89, %49 : vector<2x32xf32>
    %92 = arith.mulf %88, %87 : vector<2x32xf32>
    %93 = arith.addf %91, %92 : vector<2x32xf32>
    %94 = math.tanh %93 : vector<2x32xf32>
    %95 = arith.mulf %90, %94 : vector<2x32xf32>
    %96 = vector.extract_strided_slice %10 {offsets = [0, 1], sizes = [2, 1], strides = [1, 1]} : vector<2x8xi1> to vector<2x1xi1>
    %97 = vector.shape_cast %96 : vector<2x1xi1> to vector<2xi1>
    %98 = vector.shape_cast %97 : vector<2xi1> to vector<2x1xi1>
    %99 = vector.shape_cast %98 : vector<2x1xi1> to vector<2x1xi1>
    %100 = vector.broadcast %99 : vector<2x1xi1> to vector<2x32xi1>
    %101 = arith.select %100, %57, %95 : vector<2x32xi1>, vector<2x32xf32>
    %cst_27 = arith.constant dense<0.000000e+00> : vector<2xf32>
    %102 = vector.multi_reduction <add>, %95, %cst_27 [1] : vector<2x32xf32> to vector<2xf32>
    %103 = vector.shape_cast %102 : vector<2xf32> to vector<2x1xf32>
    %cst_28 = arith.constant 3.200000e+01 : f32
    %104 = vector.broadcast %cst_28 : f32 to vector<2x1xf32>
    %105 = arith.divf %103, %104 : vector<2x1xf32>
    %106 = vector.broadcast %105 : vector<2x1xf32> to vector<2x32xf32>
    %107 = arith.subf %95, %106 : vector<2x32xf32>
    %108 = arith.mulf %107, %107 : vector<2x32xf32>
    %cst_29 = arith.constant dense<0.000000e+00> : vector<2xf32>
    %109 = vector.multi_reduction <add>, %108, %cst_29 [1] : vector<2x32xf32> to vector<2xf32>
    %110 = vector.shape_cast %109 : vector<2xf32> to vector<2x1xf32>
    %cst_30 = arith.constant 3.200000e+01 : f32
    %111 = vector.broadcast %cst_30 : f32 to vector<2x1xf32>
    %112 = arith.divf %110, %111 : vector<2x1xf32>
    %113 = vector.broadcast %105 : vector<2x1xf32> to vector<2x32xf32>
    %114 = arith.subf %95, %113 : vector<2x32xf32>
    %cst_31 = arith.constant 9.99999974E-6 : f32
    %115 = vector.broadcast %cst_31 : f32 to vector<2x1xf32>
    %116 = arith.addf %112, %115 : vector<2x1xf32>
    %117 = math.rsqrt %116 : vector<2x1xf32>
    %118 = vector.broadcast %117 : vector<2x1xf32> to vector<2x32xf32>
    %119 = arith.mulf %114, %118 : vector<2x32xf32>
    %120 = vector.extract_strided_slice %7 {offsets = [0, 2, 0], sizes = [2, 1, 128], strides = [1, 1, 1]} : vector<2x8x128xf32> to vector<2x1x128xf32>
    %121 = vector.shape_cast %120 : vector<2x1x128xf32> to vector<2x128xf32>
    %cst_32 = arith.constant dense<0.000000e+00> : vector<2x128xf32>
    %122 = tpu.matmul %119, %1, %cst_32 {dimension_numbers = #tpu.dot_dimension_numbers<[1], [0], [0], [1], [0, 0, 1, 1], [], []>} : vector<2x32xf32>, vector<32x128xf32>, vector<2x128xf32> -> vector<2x128xf32>
    %123 = arith.addf %121, %122 : vector<2x128xf32>
    %124 = vector.extract_strided_slice %123 {offsets = [0, 0], sizes = [2, 96], strides = [1, 1]} : vector<2x128xf32> to vector<2x96xf32>
    %125 = arith.negf %124 : vector<2x96xf32>
    %126 = math.exp %125 : vector<2x96xf32>
    %cst_33 = arith.constant 1.000000e+00 : f32
    %127 = vector.broadcast %cst_33 : f32 to vector<2x96xf32>
    %128 = arith.addf %127, %126 : vector<2x96xf32>
    %129 = arith.divf %127, %128 : vector<2x96xf32>
    %130 = vector.extract_strided_slice %123 {offsets = [0, 96], sizes = [2, 32], strides = [1, 1]} : vector<2x128xf32> to vector<2x32xf32>
    %131 = math.tanh %130 : vector<2x32xf32>
    %132 = vector.extract_strided_slice %129 {offsets = [0, 0], sizes = [2, 32], strides = [1, 1]} : vector<2x96xf32> to vector<2x32xf32>
    %133 = vector.extract_strided_slice %129 {offsets = [0, 32], sizes = [2, 32], strides = [1, 1]} : vector<2x96xf32> to vector<2x32xf32>
    %134 = vector.extract_strided_slice %129 {offsets = [0, 64], sizes = [2, 32], strides = [1, 1]} : vector<2x96xf32> to vector<2x32xf32>
    %135 = arith.mulf %133, %93 : vector<2x32xf32>
    %136 = arith.mulf %132, %131 : vector<2x32xf32>
    %137 = arith.addf %135, %136 : vector<2x32xf32>
    %138 = math.tanh %137 : vector<2x32xf32>
    %139 = arith.mulf %134, %138 : vector<2x32xf32>
    %140 = vector.extract_strided_slice %10 {offsets = [0, 2], sizes = [2, 1], strides = [1, 1]} : vector<2x8xi1> to vector<2x1xi1>
    %141 = vector.shape_cast %140 : vector<2x1xi1> to vector<2xi1>
    %142 = vector.shape_cast %141 : vector<2xi1> to vector<2x1xi1>
    %143 = vector.shape_cast %142 : vector<2x1xi1> to vector<2x1xi1>
    %144 = vector.broadcast %143 : vector<2x1xi1> to vector<2x32xi1>
    %145 = arith.select %144, %101, %139 : vector<2x32xi1>, vector<2x32xf32>
    %cst_34 = arith.constant dense<0.000000e+00> : vector<2xf32>
    %146 = vector.multi_reduction <add>, %139, %cst_34 [1] : vector<2x32xf32> to vector<2xf32>
    %147 = vector.shape_cast %146 : vector<2xf32> to vector<2x1xf32>
    %cst_35 = arith.constant 3.200000e+01 : f32
    %148 = vector.broadcast %cst_35 : f32 to vector<2x1xf32>
    %149 = arith.divf %147, %148 : vector<2x1xf32>
    %150 = vector.broadcast %149 : vector<2x1xf32> to vector<2x32xf32>
    %151 = arith.subf %139, %150 : vector<2x32xf32>
    %152 = arith.mulf %151, %151 : vector<2x32xf32>
    %cst_36 = arith.constant dense<0.000000e+00> : vector<2xf32>
    %153 = vector.multi_reduction <add>, %152, %cst_36 [1] : vector<2x32xf32> to vector<2xf32>
    %154 = vector.shape_cast %153 : vector<2xf32> to vector<2x1xf32>
    %cst_37 = arith.constant 3.200000e+01 : f32
    %155 = vector.broadcast %cst_37 : f32 to vector<2x1xf32>
    %156 = arith.divf %154, %155 : vector<2x1xf32>
    %157 = vector.broadcast %149 : vector<2x1xf32> to vector<2x32xf32>
    %158 = arith.subf %139, %157 : vector<2x32xf32>
    %cst_38 = arith.constant 9.99999974E-6 : f32
    %159 = vector.broadcast %cst_38 : f32 to vector<2x1xf32>
    %160 = arith.addf %156, %159 : vector<2x1xf32>
    %161 = math.rsqrt %160 : vector<2x1xf32>
    %162 = vector.broadcast %161 : vector<2x1xf32> to vector<2x32xf32>
    %163 = arith.mulf %158, %162 : vector<2x32xf32>
    %164 = vector.extract_strided_slice %7 {offsets = [0, 3, 0], sizes = [2, 1, 128], strides = [1, 1, 1]} : vector<2x8x128xf32> to vector<2x1x128xf32>
    %165 = vector.shape_cast %164 : vector<2x1x128xf32> to vector<2x128xf32>
    %cst_39 = arith.constant dense<0.000000e+00> : vector<2x128xf32>
    %166 = tpu.matmul %163, %1, %cst_39 {dimension_numbers = #tpu.dot_dimension_numbers<[1], [0], [0], [1], [0, 0, 1, 1], [], []>} : vector<2x32xf32>, vector<32x128xf32>, vector<2x128xf32> -> vector<2x128xf32>
    %167 = arith.addf %165, %166 : vector<2x128xf32>
    %168 = vector.extract_strided_slice %167 {offsets = [0, 0], sizes = [2, 96], strides = [1, 1]} : vector<2x128xf32> to vector<2x96xf32>
    %169 = arith.negf %168 : vector<2x96xf32>
    %170 = math.exp %169 : vector<2x96xf32>
    %cst_40 = arith.constant 1.000000e+00 : f32
    %171 = vector.broadcast %cst_40 : f32 to vector<2x96xf32>
    %172 = arith.addf %171, %170 : vector<2x96xf32>
    %173 = arith.divf %171, %172 : vector<2x96xf32>
    %174 = vector.extract_strided_slice %167 {offsets = [0, 96], sizes = [2, 32], strides = [1, 1]} : vector<2x128xf32> to vector<2x32xf32>
    %175 = math.tanh %174 : vector<2x32xf32>
    %176 = vector.extract_strided_slice %173 {offsets = [0, 0], sizes = [2, 32], strides = [1, 1]} : vector<2x96xf32> to vector<2x32xf32>
    %177 = vector.extract_strided_slice %173 {offsets = [0, 32], sizes = [2, 32], strides = [1, 1]} : vector<2x96xf32> to vector<2x32xf32>
    %178 = vector.extract_strided_slice %173 {offsets = [0, 64], sizes = [2, 32], strides = [1, 1]} : vector<2x96xf32> to vector<2x32xf32>
    %179 = arith.mulf %177, %137 : vector<2x32xf32>
    %180 = arith.mulf %176, %175 : vector<2x32xf32>
    %181 = arith.addf %179, %180 : vector<2x32xf32>
    %182 = math.tanh %181 : vector<2x32xf32>
    %183 = arith.mulf %178, %182 : vector<2x32xf32>
    %184 = vector.extract_strided_slice %10 {offsets = [0, 3], sizes = [2, 1], strides = [1, 1]} : vector<2x8xi1> to vector<2x1xi1>
    %185 = vector.shape_cast %184 : vector<2x1xi1> to vector<2xi1>
    %186 = vector.shape_cast %185 : vector<2xi1> to vector<2x1xi1>
    %187 = vector.shape_cast %186 : vector<2x1xi1> to vector<2x1xi1>
    %188 = vector.broadcast %187 : vector<2x1xi1> to vector<2x32xi1>
    %189 = arith.select %188, %145, %183 : vector<2x32xi1>, vector<2x32xf32>
    %cst_41 = arith.constant dense<0.000000e+00> : vector<2xf32>
    %190 = vector.multi_reduction <add>, %183, %cst_41 [1] : vector<2x32xf32> to vector<2xf32>
    %191 = vector.shape_cast %190 : vector<2xf32> to vector<2x1xf32>
    %cst_42 = arith.constant 3.200000e+01 : f32
    %192 = vector.broadcast %cst_42 : f32 to vector<2x1xf32>
    %193 = arith.divf %191, %192 : vector<2x1xf32>
    %194 = vector.broadcast %193 : vector<2x1xf32> to vector<2x32xf32>
    %195 = arith.subf %183, %194 : vector<2x32xf32>
    %196 = arith.mulf %195, %195 : vector<2x32xf32>
    %cst_43 = arith.constant dense<0.000000e+00> : vector<2xf32>
    %197 = vector.multi_reduction <add>, %196, %cst_43 [1] : vector<2x32xf32> to vector<2xf32>
    %198 = vector.shape_cast %197 : vector<2xf32> to vector<2x1xf32>
    %cst_44 = arith.constant 3.200000e+01 : f32
    %199 = vector.broadcast %cst_44 : f32 to vector<2x1xf32>
    %200 = arith.divf %198, %199 : vector<2x1xf32>
    %201 = vector.broadcast %193 : vector<2x1xf32> to vector<2x32xf32>
    %202 = arith.subf %183, %201 : vector<2x32xf32>
    %cst_45 = arith.constant 9.99999974E-6 : f32
    %203 = vector.broadcast %cst_45 : f32 to vector<2x1xf32>
    %204 = arith.addf %200, %203 : vector<2x1xf32>
    %205 = math.rsqrt %204 : vector<2x1xf32>
    %206 = vector.broadcast %205 : vector<2x1xf32> to vector<2x32xf32>
    %207 = arith.mulf %202, %206 : vector<2x32xf32>
    %208 = vector.extract_strided_slice %7 {offsets = [0, 4, 0], sizes = [2, 1, 128], strides = [1, 1, 1]} : vector<2x8x128xf32> to vector<2x1x128xf32>
    %209 = vector.shape_cast %208 : vector<2x1x128xf32> to vector<2x128xf32>
    %cst_46 = arith.constant dense<0.000000e+00> : vector<2x128xf32>
    %210 = tpu.matmul %207, %1, %cst_46 {dimension_numbers = #tpu.dot_dimension_numbers<[1], [0], [0], [1], [0, 0, 1, 1], [], []>} : vector<2x32xf32>, vector<32x128xf32>, vector<2x128xf32> -> vector<2x128xf32>
    %211 = arith.addf %209, %210 : vector<2x128xf32>
    %212 = vector.extract_strided_slice %211 {offsets = [0, 0], sizes = [2, 96], strides = [1, 1]} : vector<2x128xf32> to vector<2x96xf32>
    %213 = arith.negf %212 : vector<2x96xf32>
    %214 = math.exp %213 : vector<2x96xf32>
    %cst_47 = arith.constant 1.000000e+00 : f32
    %215 = vector.broadcast %cst_47 : f32 to vector<2x96xf32>
    %216 = arith.addf %215, %214 : vector<2x96xf32>
    %217 = arith.divf %215, %216 : vector<2x96xf32>
    %218 = vector.extract_strided_slice %211 {offsets = [0, 96], sizes = [2, 32], strides = [1, 1]} : vector<2x128xf32> to vector<2x32xf32>
    %219 = math.tanh %218 : vector<2x32xf32>
    %220 = vector.extract_strided_slice %217 {offsets = [0, 0], sizes = [2, 32], strides = [1, 1]} : vector<2x96xf32> to vector<2x32xf32>
    %221 = vector.extract_strided_slice %217 {offsets = [0, 32], sizes = [2, 32], strides = [1, 1]} : vector<2x96xf32> to vector<2x32xf32>
    %222 = vector.extract_strided_slice %217 {offsets = [0, 64], sizes = [2, 32], strides = [1, 1]} : vector<2x96xf32> to vector<2x32xf32>
    %223 = arith.mulf %221, %181 : vector<2x32xf32>
    %224 = arith.mulf %220, %219 : vector<2x32xf32>
    %225 = arith.addf %223, %224 : vector<2x32xf32>
    %226 = math.tanh %225 : vector<2x32xf32>
    %227 = arith.mulf %222, %226 : vector<2x32xf32>
    %228 = vector.extract_strided_slice %10 {offsets = [0, 4], sizes = [2, 1], strides = [1, 1]} : vector<2x8xi1> to vector<2x1xi1>
    %229 = vector.shape_cast %228 : vector<2x1xi1> to vector<2xi1>
    %230 = vector.shape_cast %229 : vector<2xi1> to vector<2x1xi1>
    %231 = vector.shape_cast %230 : vector<2x1xi1> to vector<2x1xi1>
    %232 = vector.broadcast %231 : vector<2x1xi1> to vector<2x32xi1>
    %233 = arith.select %232, %189, %227 : vector<2x32xi1>, vector<2x32xf32>
    %cst_48 = arith.constant dense<0.000000e+00> : vector<2xf32>
    %234 = vector.multi_reduction <add>, %227, %cst_48 [1] : vector<2x32xf32> to vector<2xf32>
    %235 = vector.shape_cast %234 : vector<2xf32> to vector<2x1xf32>
    %cst_49 = arith.constant 3.200000e+01 : f32
    %236 = vector.broadcast %cst_49 : f32 to vector<2x1xf32>
    %237 = arith.divf %235, %236 : vector<2x1xf32>
    %238 = vector.broadcast %237 : vector<2x1xf32> to vector<2x32xf32>
    %239 = arith.subf %227, %238 : vector<2x32xf32>
    %240 = arith.mulf %239, %239 : vector<2x32xf32>
    %cst_50 = arith.constant dense<0.000000e+00> : vector<2xf32>
    %241 = vector.multi_reduction <add>, %240, %cst_50 [1] : vector<2x32xf32> to vector<2xf32>
    %242 = vector.shape_cast %241 : vector<2xf32> to vector<2x1xf32>
    %cst_51 = arith.constant 3.200000e+01 : f32
    %243 = vector.broadcast %cst_51 : f32 to vector<2x1xf32>
    %244 = arith.divf %242, %243 : vector<2x1xf32>
    %245 = vector.broadcast %237 : vector<2x1xf32> to vector<2x32xf32>
    %246 = arith.subf %227, %245 : vector<2x32xf32>
    %cst_52 = arith.constant 9.99999974E-6 : f32
    %247 = vector.broadcast %cst_52 : f32 to vector<2x1xf32>
    %248 = arith.addf %244, %247 : vector<2x1xf32>
    %249 = math.rsqrt %248 : vector<2x1xf32>
    %250 = vector.broadcast %249 : vector<2x1xf32> to vector<2x32xf32>
    %251 = arith.mulf %246, %250 : vector<2x32xf32>
    %252 = vector.extract_strided_slice %7 {offsets = [0, 5, 0], sizes = [2, 1, 128], strides = [1, 1, 1]} : vector<2x8x128xf32> to vector<2x1x128xf32>
    %253 = vector.shape_cast %252 : vector<2x1x128xf32> to vector<2x128xf32>
    %cst_53 = arith.constant dense<0.000000e+00> : vector<2x128xf32>
    %254 = tpu.matmul %251, %1, %cst_53 {dimension_numbers = #tpu.dot_dimension_numbers<[1], [0], [0], [1], [0, 0, 1, 1], [], []>} : vector<2x32xf32>, vector<32x128xf32>, vector<2x128xf32> -> vector<2x128xf32>
    %255 = arith.addf %253, %254 : vector<2x128xf32>
    %256 = vector.extract_strided_slice %255 {offsets = [0, 0], sizes = [2, 96], strides = [1, 1]} : vector<2x128xf32> to vector<2x96xf32>
    %257 = arith.negf %256 : vector<2x96xf32>
    %258 = math.exp %257 : vector<2x96xf32>
    %cst_54 = arith.constant 1.000000e+00 : f32
    %259 = vector.broadcast %cst_54 : f32 to vector<2x96xf32>
    %260 = arith.addf %259, %258 : vector<2x96xf32>
    %261 = arith.divf %259, %260 : vector<2x96xf32>
    %262 = vector.extract_strided_slice %255 {offsets = [0, 96], sizes = [2, 32], strides = [1, 1]} : vector<2x128xf32> to vector<2x32xf32>
    %263 = math.tanh %262 : vector<2x32xf32>
    %264 = vector.extract_strided_slice %261 {offsets = [0, 0], sizes = [2, 32], strides = [1, 1]} : vector<2x96xf32> to vector<2x32xf32>
    %265 = vector.extract_strided_slice %261 {offsets = [0, 32], sizes = [2, 32], strides = [1, 1]} : vector<2x96xf32> to vector<2x32xf32>
    %266 = vector.extract_strided_slice %261 {offsets = [0, 64], sizes = [2, 32], strides = [1, 1]} : vector<2x96xf32> to vector<2x32xf32>
    %267 = arith.mulf %265, %225 : vector<2x32xf32>
    %268 = arith.mulf %264, %263 : vector<2x32xf32>
    %269 = arith.addf %267, %268 : vector<2x32xf32>
    %270 = math.tanh %269 : vector<2x32xf32>
    %271 = arith.mulf %266, %270 : vector<2x32xf32>
    %272 = vector.extract_strided_slice %10 {offsets = [0, 5], sizes = [2, 1], strides = [1, 1]} : vector<2x8xi1> to vector<2x1xi1>
    %273 = vector.shape_cast %272 : vector<2x1xi1> to vector<2xi1>
    %274 = vector.shape_cast %273 : vector<2xi1> to vector<2x1xi1>
    %275 = vector.shape_cast %274 : vector<2x1xi1> to vector<2x1xi1>
    %276 = vector.broadcast %275 : vector<2x1xi1> to vector<2x32xi1>
    %277 = arith.select %276, %233, %271 : vector<2x32xi1>, vector<2x32xf32>
    %cst_55 = arith.constant dense<0.000000e+00> : vector<2xf32>
    %278 = vector.multi_reduction <add>, %271, %cst_55 [1] : vector<2x32xf32> to vector<2xf32>
    %279 = vector.shape_cast %278 : vector<2xf32> to vector<2x1xf32>
    %cst_56 = arith.constant 3.200000e+01 : f32
    %280 = vector.broadcast %cst_56 : f32 to vector<2x1xf32>
    %281 = arith.divf %279, %280 : vector<2x1xf32>
    %282 = vector.broadcast %281 : vector<2x1xf32> to vector<2x32xf32>
    %283 = arith.subf %271, %282 : vector<2x32xf32>
    %284 = arith.mulf %283, %283 : vector<2x32xf32>
    %cst_57 = arith.constant dense<0.000000e+00> : vector<2xf32>
    %285 = vector.multi_reduction <add>, %284, %cst_57 [1] : vector<2x32xf32> to vector<2xf32>
    %286 = vector.shape_cast %285 : vector<2xf32> to vector<2x1xf32>
    %cst_58 = arith.constant 3.200000e+01 : f32
    %287 = vector.broadcast %cst_58 : f32 to vector<2x1xf32>
    %288 = arith.divf %286, %287 : vector<2x1xf32>
    %289 = vector.broadcast %281 : vector<2x1xf32> to vector<2x32xf32>
    %290 = arith.subf %271, %289 : vector<2x32xf32>
    %cst_59 = arith.constant 9.99999974E-6 : f32
    %291 = vector.broadcast %cst_59 : f32 to vector<2x1xf32>
    %292 = arith.addf %288, %291 : vector<2x1xf32>
    %293 = math.rsqrt %292 : vector<2x1xf32>
    %294 = vector.broadcast %293 : vector<2x1xf32> to vector<2x32xf32>
    %295 = arith.mulf %290, %294 : vector<2x32xf32>
    %296 = vector.extract_strided_slice %7 {offsets = [0, 6, 0], sizes = [2, 1, 128], strides = [1, 1, 1]} : vector<2x8x128xf32> to vector<2x1x128xf32>
    %297 = vector.shape_cast %296 : vector<2x1x128xf32> to vector<2x128xf32>
    %cst_60 = arith.constant dense<0.000000e+00> : vector<2x128xf32>
    %298 = tpu.matmul %295, %1, %cst_60 {dimension_numbers = #tpu.dot_dimension_numbers<[1], [0], [0], [1], [0, 0, 1, 1], [], []>} : vector<2x32xf32>, vector<32x128xf32>, vector<2x128xf32> -> vector<2x128xf32>
    %299 = arith.addf %297, %298 : vector<2x128xf32>
    %300 = vector.extract_strided_slice %299 {offsets = [0, 0], sizes = [2, 96], strides = [1, 1]} : vector<2x128xf32> to vector<2x96xf32>
    %301 = arith.negf %300 : vector<2x96xf32>
    %302 = math.exp %301 : vector<2x96xf32>
    %cst_61 = arith.constant 1.000000e+00 : f32
    %303 = vector.broadcast %cst_61 : f32 to vector<2x96xf32>
    %304 = arith.addf %303, %302 : vector<2x96xf32>
    %305 = arith.divf %303, %304 : vector<2x96xf32>
    %306 = vector.extract_strided_slice %299 {offsets = [0, 96], sizes = [2, 32], strides = [1, 1]} : vector<2x128xf32> to vector<2x32xf32>
    %307 = math.tanh %306 : vector<2x32xf32>
    %308 = vector.extract_strided_slice %305 {offsets = [0, 0], sizes = [2, 32], strides = [1, 1]} : vector<2x96xf32> to vector<2x32xf32>
    %309 = vector.extract_strided_slice %305 {offsets = [0, 32], sizes = [2, 32], strides = [1, 1]} : vector<2x96xf32> to vector<2x32xf32>
    %310 = vector.extract_strided_slice %305 {offsets = [0, 64], sizes = [2, 32], strides = [1, 1]} : vector<2x96xf32> to vector<2x32xf32>
    %311 = arith.mulf %309, %269 : vector<2x32xf32>
    %312 = arith.mulf %308, %307 : vector<2x32xf32>
    %313 = arith.addf %311, %312 : vector<2x32xf32>
    %314 = math.tanh %313 : vector<2x32xf32>
    %315 = arith.mulf %310, %314 : vector<2x32xf32>
    %316 = vector.extract_strided_slice %10 {offsets = [0, 6], sizes = [2, 1], strides = [1, 1]} : vector<2x8xi1> to vector<2x1xi1>
    %317 = vector.shape_cast %316 : vector<2x1xi1> to vector<2xi1>
    %318 = vector.shape_cast %317 : vector<2xi1> to vector<2x1xi1>
    %319 = vector.shape_cast %318 : vector<2x1xi1> to vector<2x1xi1>
    %320 = vector.broadcast %319 : vector<2x1xi1> to vector<2x32xi1>
    %321 = arith.select %320, %277, %315 : vector<2x32xi1>, vector<2x32xf32>
    %cst_62 = arith.constant dense<0.000000e+00> : vector<2xf32>
    %322 = vector.multi_reduction <add>, %315, %cst_62 [1] : vector<2x32xf32> to vector<2xf32>
    %323 = vector.shape_cast %322 : vector<2xf32> to vector<2x1xf32>
    %cst_63 = arith.constant 3.200000e+01 : f32
    %324 = vector.broadcast %cst_63 : f32 to vector<2x1xf32>
    %325 = arith.divf %323, %324 : vector<2x1xf32>
    %326 = vector.broadcast %325 : vector<2x1xf32> to vector<2x32xf32>
    %327 = arith.subf %315, %326 : vector<2x32xf32>
    %328 = arith.mulf %327, %327 : vector<2x32xf32>
    %cst_64 = arith.constant dense<0.000000e+00> : vector<2xf32>
    %329 = vector.multi_reduction <add>, %328, %cst_64 [1] : vector<2x32xf32> to vector<2xf32>
    %330 = vector.shape_cast %329 : vector<2xf32> to vector<2x1xf32>
    %cst_65 = arith.constant 3.200000e+01 : f32
    %331 = vector.broadcast %cst_65 : f32 to vector<2x1xf32>
    %332 = arith.divf %330, %331 : vector<2x1xf32>
    %333 = vector.broadcast %325 : vector<2x1xf32> to vector<2x32xf32>
    %334 = arith.subf %315, %333 : vector<2x32xf32>
    %cst_66 = arith.constant 9.99999974E-6 : f32
    %335 = vector.broadcast %cst_66 : f32 to vector<2x1xf32>
    %336 = arith.addf %332, %335 : vector<2x1xf32>
    %337 = math.rsqrt %336 : vector<2x1xf32>
    %338 = vector.broadcast %337 : vector<2x1xf32> to vector<2x32xf32>
    %339 = arith.mulf %334, %338 : vector<2x32xf32>
    %340 = vector.extract_strided_slice %7 {offsets = [0, 7, 0], sizes = [2, 1, 128], strides = [1, 1, 1]} : vector<2x8x128xf32> to vector<2x1x128xf32>
    %341 = vector.shape_cast %340 : vector<2x1x128xf32> to vector<2x128xf32>
    %cst_67 = arith.constant dense<0.000000e+00> : vector<2x128xf32>
    %342 = tpu.matmul %339, %1, %cst_67 {dimension_numbers = #tpu.dot_dimension_numbers<[1], [0], [0], [1], [0, 0, 1, 1], [], []>} : vector<2x32xf32>, vector<32x128xf32>, vector<2x128xf32> -> vector<2x128xf32>
    %343 = arith.addf %341, %342 : vector<2x128xf32>
    %344 = vector.extract_strided_slice %343 {offsets = [0, 0], sizes = [2, 96], strides = [1, 1]} : vector<2x128xf32> to vector<2x96xf32>
    %345 = arith.negf %344 : vector<2x96xf32>
    %346 = math.exp %345 : vector<2x96xf32>
    %cst_68 = arith.constant 1.000000e+00 : f32
    %347 = vector.broadcast %cst_68 : f32 to vector<2x96xf32>
    %348 = arith.addf %347, %346 : vector<2x96xf32>
    %349 = arith.divf %347, %348 : vector<2x96xf32>
    %350 = vector.extract_strided_slice %343 {offsets = [0, 96], sizes = [2, 32], strides = [1, 1]} : vector<2x128xf32> to vector<2x32xf32>
    %351 = math.tanh %350 : vector<2x32xf32>
    %352 = vector.extract_strided_slice %349 {offsets = [0, 0], sizes = [2, 32], strides = [1, 1]} : vector<2x96xf32> to vector<2x32xf32>
    %353 = vector.extract_strided_slice %349 {offsets = [0, 32], sizes = [2, 32], strides = [1, 1]} : vector<2x96xf32> to vector<2x32xf32>
    %354 = vector.extract_strided_slice %349 {offsets = [0, 64], sizes = [2, 32], strides = [1, 1]} : vector<2x96xf32> to vector<2x32xf32>
    %355 = arith.mulf %353, %313 : vector<2x32xf32>
    %356 = arith.mulf %352, %351 : vector<2x32xf32>
    %357 = arith.addf %355, %356 : vector<2x32xf32>
    %358 = math.tanh %357 : vector<2x32xf32>
    %359 = arith.mulf %354, %358 : vector<2x32xf32>
    %360 = vector.extract_strided_slice %10 {offsets = [0, 7], sizes = [2, 1], strides = [1, 1]} : vector<2x8xi1> to vector<2x1xi1>
    %361 = vector.shape_cast %360 : vector<2x1xi1> to vector<2xi1>
    %362 = vector.shape_cast %361 : vector<2xi1> to vector<2x1xi1>
    %363 = vector.shape_cast %362 : vector<2x1xi1> to vector<2x1xi1>
    %364 = vector.broadcast %363 : vector<2x1xi1> to vector<2x32xi1>
    %365 = arith.select %364, %321, %359 : vector<2x32xi1>, vector<2x32xf32>
    %c0_69 = arith.constant 0 : index
    %c0_70 = arith.constant 0 : index
    %366 = vector.load %arg5[%c0_69, %c0_70] : memref<2x32xf32, #tpu.memory_space<vmem>>, vector<2x32xf32>
    tpu.vector_store %arg5[%c0_69, %c0_70], %365 {strides = array<i32>} : memref<2x32xf32, #tpu.memory_space<vmem>>, vector<2x32xf32>,
    return
  }
}

</mosaic_0001>

<bundles_post_ra>
// kernel: tpu_custom_call.1
= control target key start
LH: loop header
LB: loop body
LE: loop exit
PB: predicated region body
PF: predicated region fallthrough
CT: control target
= control target key end

     0   :  { %10 = vsyncpa [#allocation3], 0  ;;  %s2584_s0 = inlined_call_operand.hbm [shape: f32[16,16], index: 0, kind: input, shape index: {}]   ;;  %s2585_s1 = inlined_call_operand.vmem [shape: f32[2,8], index: 1, kind: input, shape index: {}]   ;;  %s2586_s2 = inlined_call_operand.hbm [shape: f32[16,128], index: 2, kind: input, shape index: {}]   ;;  %s2587_s3 = inlined_call_operand.hbm [shape: f32[32,128], index: 3, kind: input, shape index: {}]   ;;  %s2588_s4 = inlined_call_operand.vmem [shape: f32[1,128], index: 4, kind: input, shape index: {}]   ;;  %s2589_s5 = inlined_call_operand.hbm [shape: f32[2,32], index: 5, kind: output, shape index: {}]  }
   0x1   :  { %11 = vsyncpa [#allocation6], 0 }
   0x2   :  { %12 = vsyncpa [#allocation4], 0  ;;  %s2144_s18 = smov [#allocation5]   ;;  %s2145_s20 = smov [#allocation2]  }
   0x3   :  { %s32_s19 = sshll.u32 %s2144_s18, 4  ;;  %s18_s21 = sshll.u32 %s2145_s20, 4  ;;  %s33_s19 = int_to_ptr.vmem [resolvable:$true] %s32_s19  ;;  %s2193_s21 = int_to_ptr.vmem [resolvable:$true] %s18_s21 }
   0x4   :  { %s2050_s24 = scalar_lea.hbm %s2586_s2, 256 }
   0x5   :  { %p2051_p0 = scmp.ne.s32.totalorder %s2586_s2, %s2050_s24  ;;  %p2054_p1 = scmp.lt.u32.totalorder %s2050_s24, %s2586_s2 }
   0x7   :  { %p2056_p2 = pnand %p2054_p1, %p2051_p0 }
   0x9   :  { %2059 = shalt.err (!%p2056_p2)
}
   0xa   :  { %s2060_s29 = scalar_lea.vmem %s33_s19, 256  ;;  %p2065_p4 = scmp.lt.s32.totalorder %s33_s19, %s33_s19 }
   0xb   :  { %p2061_p3 = scmp.ne.s32.totalorder %s33_s19, %s2060_s29  ;;  %p2066_p5 = scmp.lt.s32.totalorder %s2060_s29, %s2060_s29 }
   0xd   :  { %p2067_p6 = por %p2066_p5, %p2065_p4 }
   0xf   :  { %p2068_p7 = pnand %p2067_p6, %p2061_p3 }
  0x11   :  { %2071 = shalt.err (!%p2068_p7)
}
  0x12   :  { %s2146_s30 = smov 128   ;;  %s2147_s6 = smov 8  }
  0x13   :  { %38 = dma.hbm_to_vmem [thread:$0]  %s2586_s2, 256, %s33_s19, [#allocation6], %s2146_s30, %s2146_s30, %s2147_s6  }
  0x14   :  { %s2072_s11 = scalar_lea.hbm %s2584_s0, 256 }
  0x15   :  { %p2073_p8 = scmp.ne.s32.totalorder %s2584_s0, %s2072_s11  ;;  %p2076_p9 = scmp.lt.u32.totalorder %s2072_s11, %s2584_s0 }
  0x17   :  { %p2078_p10 = pnand %p2076_p9, %p2073_p8 }
  0x19   :  { %2081 = shalt.err (!%p2078_p10)
}
  0x1a   :  { %s2082_s16 = scalar_lea.vmem %s2193_s21, 256  ;;  %p2087_p12 = scmp.lt.s32.totalorder %s2193_s21, %s2193_s21 }
  0x1b   :  { %p2083_p11 = scmp.ne.s32.totalorder %s2193_s21, %s2082_s16  ;;  %p2088_p13 = scmp.lt.s32.totalorder %s2082_s16, %s2082_s16 }
  0x1d   :  { %p2089_p0 = por %p2088_p13, %p2087_p12 }
  0x1f   :  { %p2090_p1 = pnand %p2089_p0, %p2083_p11 }
  0x21   :  { %2093 = shalt.err (!%p2090_p1)
}
  0x22   :  { %24 = dma.hbm_to_vmem [thread:$0]  %s2584_s0, 256, %s2193_s21, [#allocation3], %s2146_s30, %s2146_s30, %s2147_s6  }
  0x23   :  { %s2148_s18 = smov [#allocation7]   ;;  %s2094_s23 = scalar_lea.hbm %s2587_s3, 512 }
  0x24   :  { %s44_s19 = sshll.u32 %s2148_s18, 4  ;;  %p2095_p2 = scmp.ne.s32.totalorder %s2587_s3, %s2094_s23  ;;  %s45_s19 = int_to_ptr.vmem [resolvable:$true] %s44_s19 }
  0x25   :  { %p2098_p3 = scmp.lt.u32.totalorder %s2094_s23, %s2587_s3 }
  0x27   :  { %p2100_p4 = pnand %p2098_p3, %p2095_p2 }
  0x29   :  { %2103 = shalt.err (!%p2100_p4)
}
  0x2a   :  { %s2104_s28 = scalar_lea.vmem %s45_s19, 512  ;;  %p2109_p6 = scmp.lt.s32.totalorder %s45_s19, %s45_s19 }
  0x2b   :  { %p2105_p5 = scmp.ne.s32.totalorder %s45_s19, %s2104_s28  ;;  %p2110_p7 = scmp.lt.s32.totalorder %s2104_s28, %s2104_s28 }
  0x2d   :  { %p2111_p8 = por %p2110_p7, %p2109_p6 }
  0x2f   :  { %p2112_p9 = pnand %p2111_p8, %p2105_p5 }
  0x31   :  { %2115 = shalt.err (!%p2112_p9)
}
  0x32   :  { %50 = dma.hbm_to_vmem [thread:$0]  %s2587_s3, 512, %s45_s19, [#allocation6], %s2146_s30, %s2146_s30, %s2147_s6  }
  0x33   :  { %2138 = dma.done.wait [#allocation3], 256  }
  0x34   :  { %2139 = vsyncadd [#allocation3], 4294967040 }
  0x35   :  { %2140 = dma.done.wait [#allocation6], 768  }
  0x36   :  { %2141 = vsyncadd [#allocation6], 4294966528  ;;  %v2149_v0 = vmov 0.0   ;;  %vm167_vm0 = vcmask 261120   ;;  %v62_v6 = vld [vmem:[#allocation5] sm:$0xff]  ;;  %v63_v7 = vld [vmem:[#allocation5 + $0x8] sm:$0xff] }
  0x37   :  { %161 = vadd.xlane.f32.xlu0 %v2149_v0  ;;  %v64_v8 = vld [vmem:[#allocation7] sm:$0xff]  ;;  %vm77_vm1 = vcmask 130048   ;;  %v2150_v9 = vmov 0.0|0.0   ;;  %v1826_v10 = vpack.c.bf16 %v63_v7, %v62_v6  ;;  %v65_v11 = vld [vmem:[#allocation7 + $0x8] sm:$0xff]  ;;  %vm2151_vm2 = vmmov 0   ;;  %v66_v14 = vld [vmem:[#allocation7 + $0x10] sm:$0xff] }
  0x38   :  { %1830 = vmatprep.subr.bf16.mxu1 %v2150_v9  ;;  %v69_v12 = vld [vmem:[#allocation2] sm:$0xff]  ;;  %1746 = vmatprep.mubr.msk.f32.mxu1 %vm2151_vm2, %v2149_v0  ;;  %v2250_v13 = vpack.c.bf16 %v65_v11, %v64_v8  ;;  %v67_v15 = vld [vmem:[#allocation7 + $0x18] sm:$0xff]  ;;  %v70_v16 = vld [vmem:[#allocation2 + $0x8] sm:$0xff]  ;;  %s2152_s30 = smov 32   ;;  %vm310_vm3 = vcmask 1041409   ;;  %vm316_vm4 = vcmask 254976  }
  0x39   :  { %1735 = vmatprep.mubr.msk.f32.mxu0 %vm77_vm1, %v69_v12  ;;  %1827 = vmatprep.subr.bf16.mxu0 %v1826_v10  ;;  %v2254_v17 = vpack.c.bf16 %v67_v15, %v66_v14  ;;  %v1660_v25 = vld [vmem:[%s2588_s4] ss:$0 sm:$0xff]  ;;  %s2153_s4 = smov 64   ;;  %vm499_vm5 = vcmask 1042434   ;;  %vm504_vm6 = vcmask 256001   ;;  %vm689_vm7 = vcmask 1043459  }
  0x3a   :  { %1832 = vmatpush3.bf16.msra.mxu1 %v2250_v13  ;;  %1829 = vmatpush3.bf16.msra.mxu0 %v1826_v10  ;;  %vm694_vm8 = vcmask 257026   ;;  %vm880_vm9 = vcmask 1044484   ;;  %vm885_vm10 = vcmask 258051   ;;  %vm1071_vm11 = vcmask 1045509  }
  0x3b   :  { %1833 = vmatprep.subr.bf16.mxu1 %v2150_v9  ;;  %1836 = vmatprep.subr.bf16.mxu0 %v2150_v9  ;;  %vm1076_vm12 = vcmask 259076   ;;  %vm1262_vm13 = vcmask 1046534   ;;  %vm1267_vm14 = vcmask 260101   ;;  %vm1453_vm15 = vcmask 1047559  }
  0x3d   :  { %1736 = vmatmul.mubr.msk.f32.vlgmr.msra.gmra.mrb[0].mxu0 %vm77_vm1, %v70_v16  ;;  %vm1458_vm1 = vcmask 261126  }
  0x3e   :  { %1835 = vmatpush3.bf16.msra.mxu1 %v2254_v17  ;;  %1838 = vmatpush3.bf16.msra.mxu0 %v2250_v13 }
  0x3f   :  { %1839 = vmatprep.subr.bf16.mxu0 %v2150_v9  ;;  %1757 = vmatprep.mubr.msk.f32.mxu0 %vm2151_vm2, %v2149_v0 }
  0x40   :  { %1842 = vmatprep.subr.bf16.mxu1 %v2150_v9 }
  0x42   :  { %1841 = vmatpush3.bf16.msra.mxu0 %v2254_v17 }
  0x43   :  { %1848 = vmatprep.subr.bf16.mxu0 %v2150_v9 }
  0xc4   :  { %v162_v1 = vpop.xlane.xlu0 %161 }
  0xc5   :  { %v164_v2 = vmul.f32 0.03125, %v162_v1 }
  0xc7   :  { %v165_v3 = vsub.f32 0.0, %v164_v2 }
  0xc9   :  { %v166_v4 = vmul.f32 %v165_v3, %v165_v3 }
  0xcb   :  { %v168_v5 = vsel %vm167_vm0, %v166_v4, 0.0 }
  0xcc   :  { %169 = vadd.xlane.f32.xlu0 %v168_v5 }
 0x110   :  { %v1737_v23 = vpop.f32.mrb[0].mxu0 }
 0x111   :  { %v150_v24 = vpop.f32.mrb[1].mxu0  ;;  %v2277_v26 = vadd.f32 %v1737_v23, %v1660_v25 }
 0x112   :  { %v2279_v30 = vadd.f32 %v1660_v25, %v150_v24 }
 0x159   :  { %v170_v18 = vpop.xlane.xlu0 %169 }
 0x15a   :  { %v171_v19 = vmul.f32 0.03125, %v170_v18 }
 0x15c   :  { %v172_v20 = vadd.f32 1e-05, %v171_v19 }
 0x15e   :  { %1906 = vrsqrt.f32 %v172_v20 }
 0x168   :  { %v1907_v21 = vpop.eup %1906 }
 0x169   :  { %v174_v22 = vmul.f32 %v1907_v21, %v165_v3 }
 0x16b   :  { %1747 = vmatmul.mubr.msk.f32.vlgmr.msra.gmra.mrb[0].mxu1 %vm167_vm0, %v174_v22 }
 0x16c   :  { %1844 = vmatpush3.bf16.msra.mxu1 %v2250_v13  ;;  %1768 = vmatprep.mubr.msk.f32.mxu1 %vm2151_vm2, %v2149_v0 }
 0x16d   :  { %1845 = vmatprep.subr.bf16.mxu1 %v2150_v9 }
 0x170   :  { %1847 = vmatpush3.bf16.msra.mxu1 %v2254_v17 }
 0x171   :  { %1854 = vmatprep.subr.bf16.mxu1 %v2150_v9 }
 0x23e   :  { %v244_v27 = vpop.f32.mrb[0].mxu1 }
 0x23f   :  { %v249_v28 = vrot.slane %v244_v27, 1  ;;  %v1748_v29 = vpop.f32.mrb[1].mxu1  ;;  %v252_v32 = vadd.f32 %v244_v27, %v2279_v30 }
 0x241   :  { %v253_v31 = vadd.f32 %v249_v28, %v2277_v26  ;;  %v1664_v36 = vmul.f32 -1.442695, %v252_v32 }
 0x243   :  { %1908 = vtanh.f32 %v253_v31  ;;  %v1665_v35 = vmul.f32 -1.442695, %v253_v31 }
 0x244   :  { %1910 = vtanh.f32 %v252_v32 }
 0x245   :  { %1912 = vpow2.f32 %v1665_v35 }
 0x246   :  { %1914 = vpow2.f32 %v1664_v36 }
 0x24d   :  { %v1909_v33 = vpop.eup %1908 }
 0x24e   :  { %274 = vrot.lane.b32.xlu1 %v1909_v33, %s2152_s30  ;;  %v1911_v34 = vpop.eup %1910 }
 0x24f   :  { %v1913_v37 = vpop.eup %1912 }
 0x250   :  { %v261_v38 = vadd.f32 1.0, %v1913_v37  ;;  %v1915_v39 = vpop.eup %1914 }
 0x251   :  { %v260_v40 = vadd.f32 1.0, %v1915_v39 }
 0x252   :  { %272 = vrot.lane.b32.xlu1 %v1911_v34, %s2152_s30  ;;  %1916 = vrcp.f32 %v261_v38 }
 0x253   :  { %1918 = vrcp.f32 %v260_v40 }
 0x25c   :  { %v1917_v41 = vpop.eup %1916 }
 0x25d   :  { %v1919_v44 = vpop.eup %1918  ;;  %v269_v47 = vmul.f32 0.0, %v1917_v41 }
 0x25e   :  { %v268_v50 = vmul.f32 0.0, %v1919_v44 }
 0x2c0   :  { %v275_v42 = vpop.permute.xlu1 %274 }
 0x2c1   :  { %v279_v43 = vmul.f32 %v1917_v41, %v275_v42 }
 0x2c3   :  { %284 = vrot.lane.b32.xlu0 %v279_v43, %s2152_s30 }
 0x2c4   :  { %v273_v45 = vpop.permute.xlu1 %272 }
 0x2c5   :  { %v278_v46 = vmul.f32 %v1919_v44, %v273_v45 }
 0x2c7   :  { %282 = vrot.lane.b32.xlu1 %v278_v46, %s2152_s30 }
 0x335   :  { %v285_v48 = vpop.permute.xlu0 %284 }
 0x336   :  { %v2287_v49 = vadd.f32 %v285_v48, %v269_v47 }
 0x338   :  { %1920 = vtanh.f32 %v2287_v49  ;;  %v449_v45 = vrot.slane %v2287_v49, 7 }
 0x339   :  { %v283_v51 = vpop.permute.xlu1 %282 }
 0x33a   :  { %v2290_v52 = vadd.f32 %v283_v51, %v268_v50 }
 0x33c   :  { %1922 = vtanh.f32 %v2290_v52  ;;  %v448_v48 = vrot.slane %v2290_v52, 7 }
 0x342   :  { %v1921_v53 = vpop.eup %1920 }
 0x343   :  { %296 = vrot.lane.b32.xlu1 %v1921_v53, %s2152_s30 }
 0x346   :  { %v1923_v54 = vpop.eup %1922 }
 0x347   :  { %294 = vrot.lane.b32.xlu1 %v1923_v54, %s2152_s30 }
 0x3b5   :  { %v297_v55 = vpop.permute.xlu1 %296 }
 0x3b6   :  { %v301_v56 = vmul.f32 %v1917_v41, %v297_v55 }
 0x3b8   :  { %v309_v58 = vrot.slane %v301_v56, 7 }
 0x3b9   :  { %v295_v57 = vpop.permute.xlu1 %294 }
 0x3ba   :  { %v300_v59 = vmul.f32 %v1919_v44, %v295_v57 }
 0x3bc   :  { %v311_v60 = vsel %vm310_vm3, %v309_v58, %v300_v59 }
 0x3bd   :  { %312 = vrot.lane.b32.xlu1 %v311_v60, %s2153_s4 }
 0x42f   :  { %v2297_v61 = vpop.permute.xlu1 %312 }
 0x430   :  { %v317_v62 = vsel %vm316_vm4, %v2297_v61, 0.0 }
 0x431   :  { %318 = vadd.xlane.f32.xlu1 %v317_v62 }
 0x4be   :  { %v319_v63 = vpop.xlane.xlu1 %318 }
 0x4bf   :  { %v320_v1 = vmul.f32 0.03125, %v319_v63 }
 0x4c1   :  { %v322_v2 = vrot.slane %v320_v1, 1  ;;  %v325_v3 = vsub.f32 %v300_v59, %v320_v1 }
 0x4c3   :  { %v326_v4 = vsub.f32 %v301_v56, %v322_v2  ;;  %v327_v6 = vmul.f32 %v325_v3, %v325_v3 }
 0x4c5   :  { %v328_v5 = vmul.f32 %v326_v4, %v326_v4 }
 0x4c7   :  { %v331_v7 = vrot.slane %v328_v5, 7 }
 0x4c9   :  { %v332_v8 = vsel %vm310_vm3, %v331_v7, %v327_v6 }
 0x4ca   :  { %333 = vrot.lane.b32.xlu0 %v332_v8, %s2153_s4 }
 0x53c   :  { %v334_v10 = vpop.permute.xlu0 %333 }
 0x53d   :  { %v336_v11 = vsel %vm316_vm4, %v334_v10, 0.0 }
 0x53e   :  { %337 = vadd.xlane.f32.xlu0 %v336_v11 }
 0x5cb   :  { %v338_v12 = vpop.xlane.xlu0 %337 }
 0x5cc   :  { %v339_v14 = vmul.f32 0.03125, %v338_v12 }
 0x5ce   :  { %v340_v15 = vadd.f32 1e-05, %v339_v14 }
 0x5d0   :  { %1924 = vrsqrt.f32 %v340_v15 }
 0x5da   :  { %v1925_v16 = vpop.eup %1924 }
 0x5db   :  { %v343_v18 = vrot.slane %v1925_v16, 1  ;;  %v346_v20 = vmul.f32 %v1925_v16, %v325_v3 }
 0x5dd   :  { %v347_v19 = vmul.f32 %v343_v18, %v326_v4 }
 0x5df   :  { %v350_v21 = vrot.slane %v347_v19, 7 }
 0x5e1   :  { %v351_v22 = vsel %vm310_vm3, %v350_v21, %v346_v20 }
 0x5e2   :  { %352 = vrot.lane.b32.xlu1 %v351_v22, %s2153_s4 }
 0x654   :  { %v353_v23 = vpop.permute.xlu1 %352 }
 0x655   :  { %1758 = vmatmul.mubr.msk.f32.vlgmr.msra.gmra.mrb[2].mxu0 %vm167_vm0, %v353_v23 }
 0x656   :  { %1850 = vmatpush3.bf16.msra.mxu0 %v2250_v13  ;;  %1779 = vmatprep.mubr.msk.f32.mxu0 %vm2151_vm2, %v2149_v0 }
 0x657   :  { %1851 = vmatprep.subr.bf16.mxu0 %v2150_v9 }
 0x65a   :  { %1853 = vmatpush3.bf16.msra.mxu0 %v2254_v17 }
 0x65b   :  { %1860 = vmatprep.subr.bf16.mxu0 %v2150_v9 }
 0x728   :  { %v422_v24 = vpop.f32.mrb[2].mxu0 }
 0x729   :  { %v427_v25 = vrot.slane %v422_v24, 7  ;;  %v431_v27 = vadd.f32 %v422_v24, %v2277_v26  ;;  %v1759_v28 = vpop.f32.mrb[3].mxu0 }
 0x72b   :  { %v430_v29 = vadd.f32 %v427_v25, %v2279_v30  ;;  %1926 = vtanh.f32 %v431_v27  ;;  %v1668_v33 = vmul.f32 -1.442695, %v431_v27 }
 0x72d   :  { %1928 = vtanh.f32 %v430_v29  ;;  %v1667_v34 = vmul.f32 -1.442695, %v430_v29 }
 0x72e   :  { %1930 = vpow2.f32 %v1668_v33 }
 0x72f   :  { %1932 = vpow2.f32 %v1667_v34 }
 0x735   :  { %v1927_v31 = vpop.eup %1926 }
 0x736   :  { %458 = vrot.lane.b32.xlu0 %v1927_v31, %s2152_s30 }
 0x737   :  { %v1929_v32 = vpop.eup %1928 }
 0x738   :  { %456 = vrot.lane.b32.xlu1 %v1929_v32, %s2152_s30  ;;  %v1931_v35 = vpop.eup %1930 }
 0x739   :  { %v439_v36 = vadd.f32 1.0, %v1931_v35  ;;  %v1933_v37 = vpop.eup %1932 }
 0x73a   :  { %v438_v38 = vadd.f32 1.0, %v1933_v37 }
 0x73b   :  { %1934 = vrcp.f32 %v439_v36 }
 0x73c   :  { %1936 = vrcp.f32 %v438_v38 }
 0x745   :  { %v1935_v39 = vpop.eup %1934 }
 0x746   :  { %v1937_v43 = vpop.eup %1936  ;;  %v453_v46 = vmul.f32 %v1935_v39, %v449_v45 }
 0x747   :  { %v452_v51 = vmul.f32 %v1937_v43, %v448_v48 }
 0x7a8   :  { %v459_v40 = vpop.permute.xlu0 %458 }
 0x7a9   :  { %v463_v41 = vmul.f32 %v1935_v39, %v459_v40 }
 0x7aa   :  { %v457_v42 = vpop.permute.xlu1 %456 }
 0x7ab   :  { %468 = vrot.lane.b32.xlu1 %v463_v41, %s2152_s30  ;;  %v462_v44 = vmul.f32 %v1937_v43, %v457_v42 }
 0x7af   :  { %466 = vrot.lane.b32.xlu1 %v462_v44, %s2152_s30 }
 0x81d   :  { %v469_v47 = vpop.permute.xlu1 %468 }
 0x81e   :  { %v2321_v50 = vadd.f32 %v469_v47, %v453_v46 }
 0x820   :  { %1938 = vtanh.f32 %v2321_v50  ;;  %v638_v48 = vrot.slane %v2321_v50, 7 }
 0x821   :  { %v467_v53 = vpop.permute.xlu1 %466 }
 0x822   :  { %v2324_v54 = vadd.f32 %v467_v53, %v452_v51 }
 0x824   :  { %1940 = vtanh.f32 %v2324_v54  ;;  %v637_v47 = vrot.slane %v2324_v54, 7 }
 0x82a   :  { %v1939_v55 = vpop.eup %1938 }
 0x82b   :  { %480 = vrot.lane.b32.xlu0 %v1939_v55, %s2152_s30 }
 0x82e   :  { %v1941_v56 = vpop.eup %1940 }
 0x82f   :  { %478 = vrot.lane.b32.xlu1 %v1941_v56, %s2152_s30 }
 0x89d   :  { %v481_v49 = vpop.permute.xlu0 %480 }
 0x89e   :  { %v2329_v57 = vmul.f32 %v1935_v39, %v481_v49 }
 0x8a0   :  { %v498_v58 = vrot.slane %v2329_v57, 7 }
 0x8a1   :  { %v479_v52 = vpop.permute.xlu1 %478 }
 0x8a2   :  { %v2332_v59 = vmul.f32 %v1937_v43, %v479_v52 }
 0x8a4   :  { %v500_v60 = vsel %vm499_vm5, %v498_v58, %v2332_v59 }
 0x8a5   :  { %501 = vrot.lane.b32.xlu0 %v500_v60, %s2153_s4 }
 0x917   :  { %v502_v62 = vpop.permute.xlu0 %501 }
 0x918   :  { %v505_v63 = vsel %vm504_vm6, %v502_v62, 0.0 }
 0x919   :  { %506 = vadd.xlane.f32.xlu1 %v505_v63 }
 0x9a6   :  { %v507_v1 = vpop.xlane.xlu1 %506 }
 0x9a7   :  { %v508_v2 = vmul.f32 0.03125, %v507_v1 }
 0x9a9   :  { %v510_v3 = vrot.slane %v508_v2, 1  ;;  %v513_v4 = vsub.f32 %v2332_v59, %v508_v2 }
 0x9ab   :  { %v514_v5 = vsub.f32 %v2329_v57, %v510_v3  ;;  %v515_v7 = vmul.f32 %v513_v4, %v513_v4 }
 0x9ad   :  { %v516_v6 = vmul.f32 %v514_v5, %v514_v5 }
 0x9af   :  { %v519_v8 = vrot.slane %v516_v6, 7 }
 0x9b1   :  { %v520_v10 = vsel %vm499_vm5, %v519_v8, %v515_v7 }
 0x9b2   :  { %521 = vrot.lane.b32.xlu0 %v520_v10, %s2153_s4 }
 0xa24   :  { %v522_v11 = vpop.permute.xlu0 %521 }
 0xa25   :  { %v524_v12 = vsel %vm504_vm6, %v522_v11, 0.0 }
 0xa26   :  { %525 = vadd.xlane.f32.xlu0 %v524_v12 }
 0xab3   :  { %v526_v14 = vpop.xlane.xlu0 %525 }
 0xab4   :  { %v527_v15 = vmul.f32 0.03125, %v526_v14 }
 0xab6   :  { %v528_v16 = vadd.f32 1e-05, %v527_v15 }
 0xab8   :  { %1942 = vrsqrt.f32 %v528_v16 }
 0xac2   :  { %v1943_v18 = vpop.eup %1942 }
 0xac3   :  { %v531_v19 = vrot.slane %v1943_v18, 1  ;;  %v534_v20 = vmul.f32 %v1943_v18, %v513_v4 }
 0xac5   :  { %v535_v21 = vmul.f32 %v531_v19, %v514_v5  ;;  %v538_v22 = vrot.slane %v534_v20, 1 }
 0xac7   :  { %v539_v23 = vsel %vm310_vm3, %v535_v21, %v538_v22 }
 0xac8   :  { %540 = vrot.lane.b32.xlu1 %v539_v23, %s2153_s4 }
 0xb3a   :  { %v541_v24 = vpop.permute.xlu1 %540 }
 0xb3b   :  { %1769 = vmatmul.mubr.msk.f32.vlgmr.msra.gmra.mrb[2].mxu1 %vm167_vm0, %v541_v24 }
 0xb3c   :  { %1856 = vmatpush3.bf16.msra.mxu1 %v2250_v13  ;;  %1790 = vmatprep.mubr.msk.f32.mxu1 %vm2151_vm2, %v2149_v0 }
 0xb3d   :  { %1857 = vmatprep.subr.bf16.mxu1 %v2150_v9 }
 0xb40   :  { %1859 = vmatpush3.bf16.msra.mxu1 %v2254_v17 }
 0xb41   :  { %1866 = vmatprep.subr.bf16.mxu1 %v2150_v9 }
 0xc0e   :  { %v610_v25 = vpop.f32.mrb[2].mxu1 }
 0xc0f   :  { %v615_v27 = vrot.slane %v610_v25, 6  ;;  %v616_v28 = vrot.slane %v610_v25, 7  ;;  %v1770_v29 = vpop.f32.mrb[3].mxu1 }
 0xc11   :  { %v619_v31 = vadd.f32 %v615_v27, %v2279_v30  ;;  %v620_v32 = vadd.f32 %v616_v28, %v2277_v26 }
 0xc13   :  { %1944 = vtanh.f32 %v619_v31  ;;  %v1670_v35 = vmul.f32 -1.442695, %v619_v31  ;;  %v1671_v36 = vmul.f32 -1.442695, %v620_v32 }
 0xc14   :  { %1946 = vtanh.f32 %v620_v32 }
 0xc15   :  { %1948 = vpow2.f32 %v1670_v35 }
 0xc16   :  { %1950 = vpow2.f32 %v1671_v36 }
 0xc1d   :  { %v1945_v33 = vpop.eup %1944 }
 0xc1e   :  { %v1947_v34 = vpop.eup %1946  ;;  %645 = vrot.lane.b32.xlu1 %v1945_v33, %s2152_s30 }
 0xc1f   :  { %647 = vrot.lane.b32.xlu0 %v1947_v34, %s2152_s30  ;;  %v1949_v37 = vpop.eup %1948 }
 0xc20   :  { %v1951_v38 = vpop.eup %1950  ;;  %v627_v39 = vadd.f32 1.0, %v1949_v37 }
 0xc21   :  { %v628_v40 = vadd.f32 1.0, %v1951_v38 }
 0xc22   :  { %1952 = vrcp.f32 %v627_v39 }
 0xc23   :  { %1954 = vrcp.f32 %v628_v40 }
 0xc2c   :  { %v1953_v41 = vpop.eup %1952 }
 0xc2d   :  { %v1955_v43 = vpop.eup %1954  ;;  %v641_v51 = vmul.f32 %v1953_v41, %v637_v47 }
 0xc2e   :  { %v642_v53 = vmul.f32 %v1955_v43, %v638_v48 }
 0xc90   :  { %v646_v42 = vpop.permute.xlu1 %645 }
 0xc91   :  { %v648_v44 = vpop.permute.xlu0 %647  ;;  %v651_v45 = vmul.f32 %v1953_v41, %v646_v42 }
 0xc92   :  { %v652_v46 = vmul.f32 %v1955_v43, %v648_v44 }
 0xc93   :  { %655 = vrot.lane.b32.xlu0 %v651_v45, %s2152_s30 }
 0xc94   :  { %657 = vrot.lane.b32.xlu1 %v652_v46, %s2152_s30 }
 0xd05   :  { %v656_v55 = vpop.permute.xlu0 %655 }
 0xd06   :  { %v658_v56 = vpop.permute.xlu1 %657  ;;  %v2358_v49 = vadd.f32 %v656_v55, %v641_v51 }
 0xd07   :  { %v2360_v52 = vadd.f32 %v658_v56, %v642_v53 }
 0xd08   :  { %1956 = vtanh.f32 %v2358_v49  ;;  %v828_v56 = vrot.slane %v2358_v49, 7 }
 0xd09   :  { %1958 = vtanh.f32 %v2360_v52 }
 0xd12   :  { %v1957_v58 = vpop.eup %1956 }
 0xd13   :  { %v1959_v60 = vpop.eup %1958  ;;  %667 = vrot.lane.b32.xlu0 %v1957_v58, %s2152_s30  ;;  %v829_v58 = vrot.slane %v2360_v52, 7 }
 0xd14   :  { %669 = vrot.lane.b32.xlu1 %v1959_v60, %s2152_s30 }
 0xd85   :  { %v668_v50 = vpop.permute.xlu0 %667 }
 0xd86   :  { %v670_v54 = vpop.permute.xlu1 %669  ;;  %v2369_v1 = vmul.f32 %v1953_v41, %v668_v50 }
 0xd87   :  { %v2366_v62 = vmul.f32 %v1955_v43, %v670_v54 }
 0xd89   :  { %v688_v63 = vrot.slane %v2366_v62, 7 }
 0xd8b   :  { %v690_v2 = vsel %vm689_vm7, %v688_v63, %v2369_v1 }
 0xd8c   :  { %691 = vrot.lane.b32.xlu1 %v690_v2, %s2153_s4 }
 0xdfe   :  { %v692_v3 = vpop.permute.xlu1 %691 }
 0xdff   :  { %v695_v4 = vsel %vm694_vm8, %v692_v3, 0.0 }
 0xe00   :  { %696 = vadd.xlane.f32.xlu0 %v695_v4 }
 0xe8d   :  { %v697_v5 = vpop.xlane.xlu0 %696 }
 0xe8e   :  { %v698_v6 = vmul.f32 0.03125, %v697_v5 }
 0xe90   :  { %v700_v7 = vrot.slane %v698_v6, 1  ;;  %v703_v8 = vsub.f32 %v2369_v1, %v698_v6 }
 0xe92   :  { %v704_v10 = vsub.f32 %v2366_v62, %v700_v7  ;;  %v705_v12 = vmul.f32 %v703_v8, %v703_v8 }
 0xe94   :  { %v706_v11 = vmul.f32 %v704_v10, %v704_v10 }
 0xe96   :  { %v709_v14 = vrot.slane %v706_v11, 7 }
 0xe98   :  { %v710_v15 = vsel %vm689_vm7, %v709_v14, %v705_v12 }
 0xe99   :  { %711 = vrot.lane.b32.xlu1 %v710_v15, %s2153_s4 }
 0xf0b   :  { %v712_v16 = vpop.permute.xlu1 %711 }
 0xf0c   :  { %v714_v18 = vsel %vm694_vm8, %v712_v16, 0.0 }
 0xf0d   :  { %715 = vadd.xlane.f32.xlu1 %v714_v18 }
 0xf9a   :  { %v716_v19 = vpop.xlane.xlu1 %715 }
 0xf9b   :  { %v717_v20 = vmul.f32 0.03125, %v716_v19 }
 0xf9d   :  { %v718_v21 = vadd.f32 1e-05, %v717_v20 }
 0xf9f   :  { %1960 = vrsqrt.f32 %v718_v21 }
 0xfa9   :  { %v1961_v22 = vpop.eup %1960 }
 0xfaa   :  { %v721_v23 = vrot.slane %v1961_v22, 1  ;;  %v724_v24 = vmul.f32 %v1961_v22, %v703_v8 }
 0xfac   :  { %v725_v25 = vmul.f32 %v721_v23, %v704_v10  ;;  %v728_v27 = vrot.slane %v724_v24, 2 }
 0xfae   :  { %v729_v28 = vrot.slane %v725_v25, 1 }
 0xfb0   :  { %v730_v29 = vsel %vm310_vm3, %v729_v28, %v728_v27 }
 0xfb1   :  { %731 = vrot.lane.b32.xlu0 %v730_v29, %s2153_s4 }
0x1023   :  { %v732_v31 = vpop.permute.xlu0 %731 }
0x1024   :  { %1780 = vmatmul.mubr.msk.f32.vlgmr.msra.gmra.mrb[4].mxu0 %vm167_vm0, %v732_v31 }
0x1025   :  { %1862 = vmatpush3.bf16.msra.mxu0 %v2250_v13  ;;  %1801 = vmatprep.mubr.msk.f32.mxu0 %vm2151_vm2, %v2149_v0 }
0x1026   :  { %1863 = vmatprep.subr.bf16.mxu0 %v2150_v9 }
0x1029   :  { %1865 = vmatpush3.bf16.msra.mxu0 %v2254_v17 }
0x102a   :  { %1872 = vmatprep.subr.bf16.mxu0 %v2150_v9 }
0x10f7   :  { %v801_v32 = vpop.f32.mrb[4].mxu0 }
0x10f8   :  { %v806_v33 = vrot.slane %v801_v32, 5  ;;  %v807_v34 = vrot.slane %v801_v32, 6  ;;  %v1781_v35 = vpop.f32.mrb[5].mxu0 }
0x10fa   :  { %v810_v36 = vadd.f32 %v806_v33, %v2279_v30  ;;  %v811_v37 = vadd.f32 %v807_v34, %v2277_v26 }
0x10fc   :  { %1962 = vtanh.f32 %v810_v36  ;;  %v1673_v40 = vmul.f32 -1.442695, %v810_v36  ;;  %v1674_v41 = vmul.f32 -1.442695, %v811_v37 }
0x10fd   :  { %1964 = vtanh.f32 %v811_v37 }
0x10fe   :  { %1966 = vpow2.f32 %v1673_v40 }
0x10ff   :  { %1968 = vpow2.f32 %v1674_v41 }
0x1106   :  { %v1963_v38 = vpop.eup %1962 }
0x1107   :  { %v1965_v39 = vpop.eup %1964  ;;  %836 = vrot.lane.b32.xlu0 %v1963_v38, %s2152_s30 }
0x1108   :  { %838 = vrot.lane.b32.xlu1 %v1965_v39, %s2152_s30  ;;  %v1967_v42 = vpop.eup %1966 }
0x1109   :  { %v1969_v43 = vpop.eup %1968  ;;  %v818_v44 = vadd.f32 1.0, %v1967_v42 }
0x110a   :  { %v819_v45 = vadd.f32 1.0, %v1969_v43 }
0x110b   :  { %1970 = vrcp.f32 %v818_v44 }
0x110c   :  { %1972 = vrcp.f32 %v819_v45 }
0x1115   :  { %v1971_v46 = vpop.eup %1970 }
0x1116   :  { %v1973_v48 = vpop.eup %1972  ;;  %v832_v60 = vmul.f32 %v1971_v46, %v828_v56 }
0x1117   :  { %v833_v54 = vmul.f32 %v1973_v48, %v829_v58 }
0x1179   :  { %v837_v47 = vpop.permute.xlu0 %836 }
0x117a   :  { %v839_v51 = vpop.permute.xlu1 %838  ;;  %v842_v53 = vmul.f32 %v1971_v46, %v837_v47 }
0x117b   :  { %v843_v55 = vmul.f32 %v1973_v48, %v839_v51 }
0x117c   :  { %846 = vrot.lane.b32.xlu1 %v842_v53, %s2152_s30 }
0x117d   :  { %848 = vrot.lane.b32.xlu0 %v843_v55, %s2152_s30 }
0x11ee   :  { %v847_v50 = vpop.permute.xlu1 %846 }
0x11ef   :  { %v849_v63 = vpop.permute.xlu0 %848  ;;  %v2395_v2 = vadd.f32 %v847_v50, %v832_v60 }
0x11f0   :  { %v2397_v3 = vadd.f32 %v849_v63, %v833_v54 }
0x11f1   :  { %1974 = vtanh.f32 %v2395_v2 }
0x11f2   :  { %1976 = vtanh.f32 %v2397_v3 }
0x11fb   :  { %v1975_v4 = vpop.eup %1974 }
0x11fc   :  { %v1977_v5 = vpop.eup %1976  ;;  %858 = vrot.lane.b32.xlu1 %v1975_v4, %s2152_s30 }
0x11fd   :  { %860 = vrot.lane.b32.xlu0 %v1977_v5, %s2152_s30  ;;  %v1019_v5 = vrot.slane %v2395_v2, 7 }
0x126e   :  { %v859_v52 = vpop.permute.xlu1 %858 }
0x126f   :  { %v861_v49 = vpop.permute.xlu0 %860  ;;  %v2406_v8 = vmul.f32 %v1971_v46, %v859_v52 }
0x1270   :  { %v2403_v6 = vmul.f32 %v1973_v48, %v861_v49  ;;  %v1020_v49 = vrot.slane %v2397_v3, 7 }
0x1272   :  { %v879_v7 = vrot.slane %v2403_v6, 7 }
0x1274   :  { %v881_v10 = vsel %vm880_vm9, %v879_v7, %v2406_v8 }
0x1275   :  { %882 = vrot.lane.b32.xlu0 %v881_v10, %s2153_s4 }
0x12e7   :  { %v883_v11 = vpop.permute.xlu0 %882 }
0x12e8   :  { %v886_v12 = vsel %vm885_vm10, %v883_v11, 0.0 }
0x12e9   :  { %887 = vadd.xlane.f32.xlu1 %v886_v12 }
0x1376   :  { %v888_v14 = vpop.xlane.xlu1 %887 }
0x1377   :  { %v889_v15 = vmul.f32 0.03125, %v888_v14 }
0x1379   :  { %v891_v16 = vrot.slane %v889_v15, 1  ;;  %v894_v18 = vsub.f32 %v2406_v8, %v889_v15 }
0x137b   :  { %v895_v19 = vsub.f32 %v2403_v6, %v891_v16  ;;  %v896_v21 = vmul.f32 %v894_v18, %v894_v18 }
0x137d   :  { %v897_v20 = vmul.f32 %v895_v19, %v895_v19 }
0x137f   :  { %v900_v22 = vrot.slane %v897_v20, 7 }
0x1381   :  { %v901_v23 = vsel %vm880_vm9, %v900_v22, %v896_v21 }
0x1382   :  { %902 = vrot.lane.b32.xlu0 %v901_v23, %s2153_s4 }
0x13f4   :  { %v903_v24 = vpop.permute.xlu0 %902 }
0x13f5   :  { %v905_v25 = vsel %vm885_vm10, %v903_v24, 0.0 }
0x13f6   :  { %906 = vadd.xlane.f32.xlu0 %v905_v25 }
0x1483   :  { %v907_v27 = vpop.xlane.xlu0 %906 }
0x1484   :  { %v908_v28 = vmul.f32 0.03125, %v907_v27 }
0x1486   :  { %v909_v29 = vadd.f32 1e-05, %v908_v28 }
0x1488   :  { %1978 = vrsqrt.f32 %v909_v29 }
0x1492   :  { %v1979_v31 = vpop.eup %1978 }
0x1493   :  { %v912_v32 = vrot.slane %v1979_v31, 1  ;;  %v915_v33 = vmul.f32 %v1979_v31, %v894_v18 }
0x1495   :  { %v916_v34 = vmul.f32 %v912_v32, %v895_v19  ;;  %v919_v35 = vrot.slane %v915_v33, 3 }
0x1497   :  { %v920_v36 = vrot.slane %v916_v34, 2 }
0x1499   :  { %v921_v37 = vsel %vm310_vm3, %v920_v36, %v919_v35 }
0x149a   :  { %922 = vrot.lane.b32.xlu1 %v921_v37, %s2153_s4 }
0x150c   :  { %v923_v38 = vpop.permute.xlu1 %922 }
0x150d   :  { %1791 = vmatmul.mubr.msk.f32.vlgmr.msra.gmra.mrb[4].mxu1 %vm167_vm0, %v923_v38 }
0x150e   :  { %1868 = vmatpush3.bf16.msra.mxu1 %v2250_v13  ;;  %1812 = vmatprep.mubr.msk.f32.mxu1 %vm2151_vm2, %v2149_v0 }
0x150f   :  { %1869 = vmatprep.subr.bf16.mxu1 %v2150_v9 }
0x1512   :  { %1871 = vmatpush3.bf16.msra.mxu1 %v2254_v17 }
0x15e0   :  { %v992_v39 = vpop.f32.mrb[4].mxu1 }
0x15e1   :  { %v997_v40 = vrot.slane %v992_v39, 4  ;;  %v998_v41 = vrot.slane %v992_v39, 5  ;;  %v1792_v42 = vpop.f32.mrb[5].mxu1 }
0x15e3   :  { %v1001_v43 = vadd.f32 %v997_v40, %v2279_v30  ;;  %v1002_v44 = vadd.f32 %v998_v41, %v2277_v26 }
0x15e5   :  { %1980 = vtanh.f32 %v1001_v43  ;;  %v1676_v47 = vmul.f32 -1.442695, %v1001_v43  ;;  %v1677_v48 = vmul.f32 -1.442695, %v1002_v44 }
0x15e6   :  { %1982 = vtanh.f32 %v1002_v44 }
0x15e7   :  { %1984 = vpow2.f32 %v1676_v47 }
0x15e8   :  { %1986 = vpow2.f32 %v1677_v48 }
0x15ef   :  { %v1981_v45 = vpop.eup %1980 }
0x15f0   :  { %v1983_v46 = vpop.eup %1982  ;;  %1027 = vrot.lane.b32.xlu1 %v1981_v45, %s2152_s30 }
0x15f1   :  { %1029 = vrot.lane.b32.xlu0 %v1983_v46, %s2152_s30  ;;  %v1985_v51 = vpop.eup %1984 }
0x15f2   :  { %v1987_v53 = vpop.eup %1986  ;;  %v1009_v55 = vadd.f32 1.0, %v1985_v51 }
0x15f3   :  { %v1010_v56 = vadd.f32 1.0, %v1987_v53 }
0x15f4   :  { %1988 = vrcp.f32 %v1009_v55 }
0x15f5   :  { %1990 = vrcp.f32 %v1010_v56 }
0x15fe   :  { %v1989_v58 = vpop.eup %1988 }
0x15ff   :  { %v1991_v54 = vpop.eup %1990  ;;  %v1023_v52 = vmul.f32 %v1989_v58, %v1019_v5 }
0x1600   :  { %v1024_v7 = vmul.f32 %v1991_v54, %v1020_v49 }
0x1662   :  { %v1028_v60 = vpop.permute.xlu1 %1027 }
0x1663   :  { %v1030_v50 = vpop.permute.xlu0 %1029  ;;  %v1033_v63 = vmul.f32 %v1989_v58, %v1028_v60 }
0x1664   :  { %v1034_v4 = vmul.f32 %v1991_v54, %v1030_v50 }
0x1665   :  { %1037 = vrot.lane.b32.xlu0 %v1033_v63, %s2152_s30 }
0x1666   :  { %1039 = vrot.lane.b32.xlu1 %v1034_v4, %s2152_s30 }
0x16d7   :  { %v1038_v10 = vpop.permute.xlu0 %1037 }
0x16d8   :  { %v1040_v11 = vpop.permute.xlu1 %1039  ;;  %v2431_v12 = vadd.f32 %v1038_v10, %v1023_v52 }
0x16d9   :  { %v2433_v14 = vadd.f32 %v1040_v11, %v1024_v7 }
0x16da   :  { %1992 = vtanh.f32 %v2431_v12  ;;  %v1210_v11 = vrot.slane %v2431_v12, 7 }
0x16db   :  { %1994 = vtanh.f32 %v2433_v14 }
0x16e4   :  { %v1993_v15 = vpop.eup %1992 }
0x16e5   :  { %v1995_v16 = vpop.eup %1994  ;;  %1049 = vrot.lane.b32.xlu0 %v1993_v15, %s2152_s30  ;;  %v1211_v15 = vrot.slane %v2433_v14, 7 }
0x16e6   :  { %1051 = vrot.lane.b32.xlu1 %v1995_v16, %s2152_s30 }
0x1757   :  { %v1050_v3 = vpop.permute.xlu0 %1049 }
0x1758   :  { %v1052_v2 = vpop.permute.xlu1 %1051  ;;  %v2442_v20 = vmul.f32 %v1989_v58, %v1050_v3 }
0x1759   :  { %v2439_v18 = vmul.f32 %v1991_v54, %v1052_v2 }
0x175b   :  { %v1070_v19 = vrot.slane %v2439_v18, 7 }
0x175d   :  { %v1072_v21 = vsel %vm1071_vm11, %v1070_v19, %v2442_v20 }
0x175e   :  { %1073 = vrot.lane.b32.xlu1 %v1072_v21, %s2153_s4 }
0x17d0   :  { %v1074_v22 = vpop.permute.xlu1 %1073 }
0x17d1   :  { %v1077_v23 = vsel %vm1076_vm12, %v1074_v22, 0.0 }
0x17d2   :  { %1078 = vadd.xlane.f32.xlu0 %v1077_v23 }
0x185f   :  { %v1079_v24 = vpop.xlane.xlu0 %1078 }
0x1860   :  { %v1080_v25 = vmul.f32 0.03125, %v1079_v24 }
0x1862   :  { %v1082_v27 = vrot.slane %v1080_v25, 1  ;;  %v1085_v28 = vsub.f32 %v2442_v20, %v1080_v25 }
0x1864   :  { %v1086_v29 = vsub.f32 %v2439_v18, %v1082_v27  ;;  %v1087_v32 = vmul.f32 %v1085_v28, %v1085_v28 }
0x1866   :  { %v1088_v31 = vmul.f32 %v1086_v29, %v1086_v29 }
0x1868   :  { %v1091_v33 = vrot.slane %v1088_v31, 7 }
0x186a   :  { %v1092_v34 = vsel %vm1071_vm11, %v1091_v33, %v1087_v32 }
0x186b   :  { %1093 = vrot.lane.b32.xlu1 %v1092_v34, %s2153_s4 }
0x18dd   :  { %v1094_v35 = vpop.permute.xlu1 %1093 }
0x18de   :  { %v1096_v36 = vsel %vm1076_vm12, %v1094_v35, 0.0 }
0x18df   :  { %1097 = vadd.xlane.f32.xlu1 %v1096_v36 }
0x196c   :  { %v1098_v37 = vpop.xlane.xlu1 %1097 }
0x196d   :  { %v1099_v38 = vmul.f32 0.03125, %v1098_v37 }
0x196f   :  { %v1100_v39 = vadd.f32 1e-05, %v1099_v38 }
0x1971   :  { %1996 = vrsqrt.f32 %v1100_v39 }
0x197b   :  { %v1997_v40 = vpop.eup %1996 }
0x197c   :  { %v1103_v41 = vrot.slane %v1997_v40, 1  ;;  %v1106_v42 = vmul.f32 %v1997_v40, %v1085_v28 }
0x197e   :  { %v1107_v43 = vmul.f32 %v1103_v41, %v1086_v29  ;;  %v1110_v44 = vrot.slane %v1106_v42, 4 }
0x1980   :  { %v1111_v45 = vrot.slane %v1107_v43, 3 }
0x1982   :  { %v1112_v46 = vsel %vm310_vm3, %v1111_v45, %v1110_v44 }
0x1983   :  { %1113 = vrot.lane.b32.xlu0 %v1112_v46, %s2153_s4 }
0x19f5   :  { %v1114_v47 = vpop.permute.xlu0 %1113 }
0x19f6   :  { %1802 = vmatmul.mubr.msk.f32.vlgmr.msra.gmra.mrb[6].mxu0 %vm167_vm0, %v1114_v47 }
0x19f7   :  { %1874 = vmatpush3.bf16.msra.mxu0 %v2250_v13  ;;  %1823 = vmatprep.mubr.msk.f32.mxu0 %vm2151_vm2, %v2149_v0 }
0x19f8   :  { %1875 = vmatprep.subr.bf16.mxu0 %v2150_v9 }
0x19fb   :  { %1877 = vmatpush3.bf16.msra.mxu0 %v2254_v17 }
0x1ac9   :  { %v1183_v48 = vpop.f32.mrb[6].mxu0 }
0x1aca   :  { %v1188_v51 = vrot.slane %v1183_v48, 3  ;;  %v1189_v53 = vrot.slane %v1183_v48, 4  ;;  %v1803_v55 = vpop.f32.mrb[7].mxu0 }
0x1acc   :  { %v1192_v56 = vadd.f32 %v1188_v51, %v2279_v30  ;;  %v1193_v58 = vadd.f32 %v1189_v53, %v2277_v26 }
0x1ace   :  { %1998 = vtanh.f32 %v1192_v56  ;;  %v1679_v0 = vmul.f32 -1.442695, %v1192_v56  ;;  %v1680_v9 = vmul.f32 -1.442695, %v1193_v58 }
0x1acf   :  { %2000 = vtanh.f32 %v1193_v58 }
0x1ad0   :  { %2002 = vpow2.f32 %v1679_v0 }
0x1ad1   :  { %2004 = vpow2.f32 %v1680_v9 }
0x1ad8   :  { %v1999_v60 = vpop.eup %1998 }
0x1ad9   :  { %v2001_v54 = vpop.eup %2000  ;;  %1218 = vrot.lane.b32.xlu0 %v1999_v60, %s2152_s30 }
0x1ada   :  { %1220 = vrot.lane.b32.xlu1 %v2001_v54, %s2152_s30  ;;  %v2003_v13 = vpop.eup %2002 }
0x1adb   :  { %v2005_v17 = vpop.eup %2004  ;;  %v1200_v50 = vadd.f32 1.0, %v2003_v13 }
0x1adc   :  { %v1201_v63 = vadd.f32 1.0, %v2005_v17 }
0x1add   :  { %2006 = vrcp.f32 %v1200_v50 }
0x1ade   :  { %2008 = vrcp.f32 %v1201_v63 }
0x1ae7   :  { %v2007_v4 = vpop.eup %2006 }
0x1ae8   :  { %v2009_v49 = vpop.eup %2008  ;;  %v1214_v16 = vmul.f32 %v2007_v4, %v1210_v11 }
0x1ae9   :  { %v1215_v2 = vmul.f32 %v2009_v49, %v1211_v15 }
0x1b4b   :  { %v1219_v5 = vpop.permute.xlu0 %1218 }
0x1b4c   :  { %v1221_v52 = vpop.permute.xlu1 %1220  ;;  %v1224_v7 = vmul.f32 %v2007_v4, %v1219_v5 }
0x1b4d   :  { %v1225_v10 = vmul.f32 %v2009_v49, %v1221_v52 }
0x1b4e   :  { %1228 = vrot.lane.b32.xlu1 %v1224_v7, %s2152_s30 }
0x1b4f   :  { %1230 = vrot.lane.b32.xlu0 %v1225_v10, %s2152_s30 }
0x1bc0   :  { %v1229_v3 = vpop.permute.xlu1 %1228 }
0x1bc1   :  { %v1231_v19 = vpop.permute.xlu0 %1230  ;;  %v2467_v21 = vadd.f32 %v1229_v3, %v1214_v16 }
0x1bc2   :  { %v2469_v22 = vadd.f32 %v1231_v19, %v1215_v2 }
0x1bc3   :  { %2010 = vtanh.f32 %v2467_v21 }
0x1bc4   :  { %2012 = vtanh.f32 %v2469_v22 }
0x1bcd   :  { %v2011_v23 = vpop.eup %2010 }
0x1bce   :  { %v2013_v24 = vpop.eup %2012  ;;  %1240 = vrot.lane.b32.xlu1 %v2011_v23, %s2152_s30 }
0x1bcf   :  { %1242 = vrot.lane.b32.xlu0 %v2013_v24, %s2152_s30  ;;  %v1401_v24 = vrot.slane %v2467_v21, 7 }
0x1c40   :  { %v1241_v14 = vpop.permute.xlu1 %1240 }
0x1c41   :  { %v1243_v12 = vpop.permute.xlu0 %1242  ;;  %v2478_v28 = vmul.f32 %v2007_v4, %v1241_v14 }
0x1c42   :  { %v2475_v25 = vmul.f32 %v2009_v49, %v1243_v12  ;;  %v1402_v12 = vrot.slane %v2469_v22, 7 }
0x1c44   :  { %v1261_v27 = vrot.slane %v2475_v25, 7 }
0x1c46   :  { %v1263_v29 = vsel %vm1262_vm13, %v1261_v27, %v2478_v28 }
0x1c47   :  { %1264 = vrot.lane.b32.xlu0 %v1263_v29, %s2153_s4 }
0x1cb9   :  { %v1265_v31 = vpop.permute.xlu0 %1264 }
0x1cba   :  { %v1268_v32 = vsel %vm1267_vm14, %v1265_v31, 0.0 }
0x1cbb   :  { %1269 = vadd.xlane.f32.xlu1 %v1268_v32 }
0x1d48   :  { %v1270_v33 = vpop.xlane.xlu1 %1269 }
0x1d49   :  { %v1271_v34 = vmul.f32 0.03125, %v1270_v33 }
0x1d4b   :  { %v1273_v35 = vrot.slane %v1271_v34, 1  ;;  %v1276_v36 = vsub.f32 %v2478_v28, %v1271_v34 }
0x1d4d   :  { %v1277_v37 = vsub.f32 %v2475_v25, %v1273_v35  ;;  %v1278_v39 = vmul.f32 %v1276_v36, %v1276_v36 }
0x1d4f   :  { %v1279_v38 = vmul.f32 %v1277_v37, %v1277_v37 }
0x1d51   :  { %v1282_v40 = vrot.slane %v1279_v38, 7 }
0x1d53   :  { %v1283_v41 = vsel %vm1262_vm13, %v1282_v40, %v1278_v39 }
0x1d54   :  { %1284 = vrot.lane.b32.xlu0 %v1283_v41, %s2153_s4 }
0x1dc6   :  { %v1285_v42 = vpop.permute.xlu0 %1284 }
0x1dc7   :  { %v1287_v43 = vsel %vm1267_vm14, %v1285_v42, 0.0 }
0x1dc8   :  { %1288 = vadd.xlane.f32.xlu0 %v1287_v43 }
0x1e55   :  { %v1289_v44 = vpop.xlane.xlu0 %1288 }
0x1e56   :  { %v1290_v45 = vmul.f32 0.03125, %v1289_v44 }
0x1e58   :  { %v1291_v46 = vadd.f32 1e-05, %v1290_v45 }
0x1e5a   :  { %2014 = vrsqrt.f32 %v1291_v46 }
0x1e64   :  { %v2015_v47 = vpop.eup %2014 }
0x1e65   :  { %v1294_v48 = vrot.slane %v2015_v47, 1  ;;  %v1297_v51 = vmul.f32 %v2015_v47, %v1276_v36 }
0x1e67   :  { %v1298_v53 = vmul.f32 %v1294_v48, %v1277_v37  ;;  %v1301_v55 = vrot.slane %v1297_v51, 5 }
0x1e69   :  { %v1302_v56 = vrot.slane %v1298_v53, 4 }
0x1e6b   :  { %v1303_v58 = vsel %vm310_vm3, %v1302_v56, %v1301_v55 }
0x1e6c   :  { %1304 = vrot.lane.b32.xlu1 %v1303_v58, %s2153_s4 }
0x1ede   :  { %v1305_v60 = vpop.permute.xlu1 %1304 }
0x1edf   :  { %1813 = vmatmul.mubr.msk.f32.vlgmr.msra.gmra.mrb[6].mxu1 %vm167_vm0, %v1305_v60 }
0x1fb2   :  { %v1374_v54 = vpop.f32.mrb[6].mxu1 }
0x1fb3   :  { %v1379_v0 = vrot.slane %v1374_v54, 2  ;;  %v1380_v9 = vrot.slane %v1374_v54, 3  ;;  %v1814_v13 = vpop.f32.mrb[7].mxu1 }
0x1fb5   :  { %v1383_v17 = vadd.f32 %v1379_v0, %v2279_v30  ;;  %v1384_v50 = vadd.f32 %v1380_v9, %v2277_v26 }
0x1fb7   :  { %2016 = vtanh.f32 %v1383_v17  ;;  %v1682_v5 = vmul.f32 -1.442695, %v1383_v17  ;;  %v1683_v49 = vmul.f32 -1.442695, %v1384_v50 }
0x1fb8   :  { %2018 = vtanh.f32 %v1384_v50 }
0x1fb9   :  { %2020 = vpow2.f32 %v1682_v5 }
0x1fba   :  { %2022 = vpow2.f32 %v1683_v49 }
0x1fc1   :  { %v2017_v63 = vpop.eup %2016 }
0x1fc2   :  { %v2019_v4 = vpop.eup %2018  ;;  %1409 = vrot.lane.b32.xlu1 %v2017_v63, %s2152_s30 }
0x1fc3   :  { %1411 = vrot.lane.b32.xlu0 %v2019_v4, %s2152_s30  ;;  %v2021_v52 = vpop.eup %2020 }
0x1fc4   :  { %v2023_v7 = vpop.eup %2022  ;;  %v1391_v10 = vadd.f32 1.0, %v2021_v52 }
0x1fc5   :  { %v1392_v11 = vadd.f32 1.0, %v2023_v7 }
0x1fc6   :  { %2024 = vrcp.f32 %v1391_v10 }
0x1fc7   :  { %2026 = vrcp.f32 %v1392_v11 }
0x1fd0   :  { %v2025_v15 = vpop.eup %2024 }
0x1fd1   :  { %v2027_v2 = vpop.eup %2026  ;;  %v1405_v14 = vmul.f32 %v2025_v15, %v1401_v24 }
0x1fd2   :  { %v1406_v27 = vmul.f32 %v2027_v2, %v1402_v12 }
0x2034   :  { %v1410_v16 = vpop.permute.xlu1 %1409 }
0x2035   :  { %v1412_v3 = vpop.permute.xlu0 %1411  ;;  %v1415_v19 = vmul.f32 %v2025_v15, %v1410_v16 }
0x2036   :  { %v1416_v23 = vmul.f32 %v2027_v2, %v1412_v3 }
0x2037   :  { %1419 = vrot.lane.b32.xlu0 %v1415_v19, %s2152_s30 }
0x2038   :  { %1421 = vrot.lane.b32.xlu1 %v1416_v23, %s2152_s30 }
0x20a9   :  { %v1420_v29 = vpop.permute.xlu0 %1419 }
0x20aa   :  { %v1422_v31 = vpop.permute.xlu1 %1421  ;;  %v2498_v32 = vadd.f32 %v1420_v29, %v1405_v14 }
0x20ab   :  { %v2500_v33 = vadd.f32 %v1422_v31, %v1406_v27 }
0x20ac   :  { %2028 = vtanh.f32 %v2498_v32 }
0x20ad   :  { %2030 = vtanh.f32 %v2500_v33 }
0x20b6   :  { %v2029_v34 = vpop.eup %2028 }
0x20b7   :  { %v2031_v35 = vpop.eup %2030  ;;  %1431 = vrot.lane.b32.xlu0 %v2029_v34, %s2152_s30 }
0x20b8   :  { %1433 = vrot.lane.b32.xlu1 %v2031_v35, %s2152_s30  ;;  %v2154_v35 = vmov 1  }
0x20b9   :  { %1898 = vset.pattern.permute.xlu1 %v2154_v35 }
0x2129   :  { %v1432_v22 = vpop.permute.xlu0 %1431 }
0x212a   :  { %v1434_v21 = vpop.permute.xlu1 %1433  ;;  %v2509_v38 = vmul.f32 %v2025_v15, %v1432_v22  ;;  %v1592_v22 = vrot.slane %v2498_v32, 7 }
0x212b   :  { %v2506_v36 = vmul.f32 %v2027_v2, %v1434_v21  ;;  %v2155_v21 = vmov 0  }
0x212c   :  { %1897 = vset.pattern.permute.xlu0 %v2155_v21 }
0x212d   :  { %v1452_v37 = vrot.slane %v2506_v36, 7 }
0x212f   :  { %v1454_v39 = vsel %vm1453_vm15, %v1452_v37, %v2509_v38  ;;  %v1593_v37 = vrot.slane %v2500_v33, 7  ;;  %v2156_v33 = vmov 3  }
0x2130   :  { %1455 = vrot.lane.b32.xlu1 %v1454_v39, %s2153_s4 }
0x21a2   :  { %v1456_v40 = vpop.permute.xlu1 %1455 }
0x21a3   :  { %v1459_v41 = vsel %vm1458_vm1, %v1456_v40, 0.0 }
0x21a4   :  { %1460 = vadd.xlane.f32.xlu0 %v1459_v41 }
0x2231   :  { %v1461_v42 = vpop.xlane.xlu0 %1460 }
0x2232   :  { %v1462_v43 = vmul.f32 0.03125, %v1461_v42 }
0x2234   :  { %v1464_v44 = vrot.slane %v1462_v43, 1  ;;  %v1467_v45 = vsub.f32 %v2509_v38, %v1462_v43 }
0x2236   :  { %v1468_v46 = vsub.f32 %v2506_v36, %v1464_v44  ;;  %v1469_v48 = vmul.f32 %v1467_v45, %v1467_v45 }
0x2238   :  { %v1470_v47 = vmul.f32 %v1468_v46, %v1468_v46 }
0x223a   :  { %v1473_v51 = vrot.slane %v1470_v47, 7 }
0x223c   :  { %v1474_v53 = vsel %vm1453_vm15, %v1473_v51, %v1469_v48  ;;  %v2157_v48 = vmov 2   ;;  %v682_v51 = vrot.slane %v2366_v62, 1  ;;  %v1446_v62 = vrot.slane %v2506_v36, 5 }
0x223d   :  { %1475 = vrot.lane.b32.xlu1 %v1474_v53, %s2153_s4  ;;  %v681_v53 = vrot.slane %v2369_v1, 2  ;;  %v1445_v1 = vrot.slane %v2509_v38, 6  ;;  %v1255_v38 = vrot.slane %v2475_v25, 4 }
0x22af   :  { %v1476_v55 = vpop.permute.xlu1 %1475 }
0x22b0   :  { %v1478_v56 = vsel %vm1458_vm1, %v1476_v55, 0.0  ;;  %v2158_v55 = vmov 6  }
0x22b1   :  { %1479 = vadd.xlane.f32.xlu1 %v1478_v56  ;;  %v2159_v56 = vmov 4  }
0x233e   :  { %v1480_v58 = vpop.xlane.xlu1 %1479 }
0x233f   :  { %v1481_v60 = vmul.f32 0.03125, %v1480_v58  ;;  %v1064_v58 = vrot.slane %v2439_v18, 3  ;;  %v492_v18 = vrot.slane %v2332_v59, 1 }
0x2341   :  { %v1482_v54 = vadd.f32 1e-05, %v1481_v60  ;;  %v1063_v60 = vrot.slane %v2442_v20, 4  ;;  %v1447_v20 = vsel %vm310_vm3, %v1446_v62, %v1445_v1  ;;  %v493_v36 = vsel %vm310_vm3, %v2329_v57, %v492_v18 }
0x2343   :  { %2032 = vrsqrt.f32 %v1482_v54  ;;  %v683_v54 = vsel %vm310_vm3, %v682_v51, %v681_v53 }
0x234d   :  { %v2033_v0 = vpop.eup %2032 }
0x234e   :  { %v1485_v9 = vrot.slane %v2033_v0, 1  ;;  %v1488_v13 = vmul.f32 %v2033_v0, %v1467_v45  ;;  %v159_v45 = vld [vmem:[%s2585_s1] sm:$0x3]  ;;  %v2160_v0 = vmov 5   ;;  %s2162_s1 = smov [#allocation8]  }
0x234f   :  { %s1650_s8 = sshll.u32 %s2162_s1, 4  ;;  %s1651_s8 = int_to_ptr.vmem [resolvable:$true] %s1650_s8 }
0x2350   :  { %v1489_v17 = vmul.f32 %v1485_v9, %v1468_v46  ;;  %v1492_v50 = vrot.slane %v1488_v13, 6  ;;  %v2161_v9 = vmov 7   ;;  %v1065_v13 = vsel %vm310_vm3, %v1064_v58, %v1063_v60  ;;  %s2116_s9 = scalar_lea.vmem %s1651_s8, 32  ;;  %p2121_p11 = scmp.lt.s32.totalorder %s1651_s8, %s1651_s8 }
0x2351   :  { %p2117_p10 = scmp.ne.s32.totalorder %s1651_s8, %s2116_s9  ;;  %p2122_p12 = scmp.lt.s32.totalorder %s2116_s9, %s2116_s9 }
0x2352   :  { %v1493_v63 = vrot.slane %v1489_v17, 5  ;;  %v873_v17 = vrot.slane %v2403_v6, 2 }
0x2353   :  { %p2123_p13 = por %p2122_p12, %p2121_p11 }
0x2354   :  { %v1494_v4 = vsel %vm310_vm3, %v1493_v63, %v1492_v50  ;;  %v872_v50 = vrot.slane %v2406_v8, 3  ;;  %v1254_v63 = vrot.slane %v2478_v28, 5 }
0x2355   :  { %1495 = vrot.lane.b32.xlu0 %v1494_v4, %s2153_s4  ;;  %p2124_p0 = pnand %p2123_p13, %p2117_p10 }
0x2356   :  { %v874_v59 = vsel %vm310_vm3, %v873_v17, %v872_v50  ;;  %v1256_v4 = vsel %vm310_vm3, %v1255_v38, %v1254_v63 }
0x23c7   :  { %v1496_v5 = vpop.permute.xlu0 %1495 }
0x23c8   :  { %1824 = vmatmul.mubr.msk.f32.vlgmr.msra.gmra.mrb[8].mxu0 %vm167_vm0, %v1496_v5  ;;  %vm160_vm0 = vcmp.gt.f32.partialorder %v159_v45, 0.5 }
0x23c9   :  { %v302_v32 = vsel %vm160_vm0, 1, %v2155_v21 }
0x249b   :  { %v1565_v49 = vpop.f32.mrb[8].mxu0 }
0x249c   :  { %v1570_v52 = vrot.slane %v1565_v49, 1  ;;  %v1571_v7 = vrot.slane %v1565_v49, 2  ;;  %v1825_v10 = vpop.f32.mrb[9].mxu0 }
0x249e   :  { %v1574_v11 = vadd.f32 %v1570_v52, %v2279_v30  ;;  %v1575_v15 = vadd.f32 %v1571_v7, %v2277_v26 }
0x24a0   :  { %2034 = vtanh.f32 %v1574_v11  ;;  %v1685_v3 = vmul.f32 -1.442695, %v1574_v11  ;;  %v1686_v19 = vmul.f32 -1.442695, %v1575_v15 }
0x24a1   :  { %2036 = vtanh.f32 %v1575_v15 }
0x24a2   :  { %2038 = vpow2.f32 %v1685_v3 }
0x24a3   :  { %2040 = vpow2.f32 %v1686_v19 }
0x24aa   :  { %v2035_v16 = vpop.eup %2034 }
0x24ab   :  { %v2037_v2 = vpop.eup %2036  ;;  %1600 = vrot.lane.b32.xlu1 %v2035_v16, %s2152_s30 }
0x24ac   :  { %1602 = vrot.lane.b32.xlu0 %v2037_v2, %s2152_s30  ;;  %v2039_v23 = vpop.eup %2038 }
0x24ad   :  { %v2041_v24 = vpop.eup %2040  ;;  %v1582_v12 = vadd.f32 1.0, %v2039_v23 }
0x24ae   :  { %v1583_v14 = vadd.f32 1.0, %v2041_v24 }
0x24af   :  { %2042 = vrcp.f32 %v1582_v12 }
0x24b0   :  { %2044 = vrcp.f32 %v1583_v14 }
0x24b9   :  { %v2525_v30 = vpop.eup %2042 }
0x24ba   :  { %v2527_v27 = vpop.eup %2044  ;;  %v1596_v39 = vmul.f32 %v2525_v30, %v1592_v22 }
0x24bb   :  { %v1597_v40 = vmul.f32 %v2527_v27, %v1593_v37 }
0x251d   :  { %v1601_v26 = vpop.permute.xlu1 %1600 }
0x251e   :  { %v1603_v29 = vpop.permute.xlu0 %1602  ;;  %v1606_v31 = vmul.f32 %v2525_v30, %v1601_v26 }
0x251f   :  { %v1607_v34 = vmul.f32 %v2527_v27, %v1603_v29 }
0x2520   :  { %1610 = vrot.lane.b32.xlu0 %v1606_v31, %s2152_s30 }
0x2521   :  { %1612 = vrot.lane.b32.xlu1 %v1607_v34, %s2152_s30 }
0x2592   :  { %v1611_v41 = vpop.permute.xlu0 %1610 }
0x2593   :  { %v1613_v42 = vpop.permute.xlu1 %1612  ;;  %v1616_v43 = vadd.f32 %v1611_v41, %v1596_v39 }
0x2594   :  { %v1617_v44 = vadd.f32 %v1613_v42, %v1597_v40 }
0x2595   :  { %2046 = vtanh.f32 %v1616_v43 }
0x2596   :  { %2048 = vtanh.f32 %v1617_v44 }
0x259f   :  { %v2047_v46 = vpop.eup %2046 }
0x25a0   :  { %v2049_v47 = vpop.eup %2048  ;;  %1622 = vrot.lane.b32.xlu0 %v2047_v46, %s2152_s30 }
0x25a1   :  { %1624 = vrot.lane.b32.xlu1 %v2049_v47, %s2152_s30 }
0x25a4   :  { %304 = vperm.xlu0 %1897, %v302_v32  }
0x25a5   :  { %487 = vperm.xlu1 %1898, %v302_v32  }
0x25a8   :  { %1900 = vset.pattern.permute.xlu0 %v2156_v33 }
0x25a9   :  { %1899 = vset.pattern.permute.xlu1 %v2157_v48  ;;  %867 = vperm.xlu0 %1900, %v302_v32  }
0x25aa   :  { %676 = vperm.xlu1 %1899, %v302_v32  }
0x25ad   :  { %1903 = vset.pattern.permute.xlu0 %v2158_v55 }
0x25ae   :  { %1901 = vset.pattern.permute.xlu1 %v2159_v56  ;;  %1440 = vperm.xlu0 %1903, %v302_v32  }
0x25af   :  { %1058 = vperm.xlu1 %1901, %v302_v32  }
0x25b2   :  { %684 = vrot.lane.b32.xlu0 %v683_v54, %s2153_s4 }
0x25b3   :  { %1902 = vset.pattern.permute.xlu1 %v2160_v0  ;;  %1905 = vset.pattern.permute.xlu0 %v2161_v9 }
0x25b4   :  { %1249 = vperm.xlu1 %1902, %v302_v32  }
0x25b6   :  { %1066 = vrot.lane.b32.xlu0 %v1065_v13, %s2153_s4 }
0x25b8   :  { %1904 = vset.pattern.permute.xlu1 %v2161_v9 }
0x25b9   :  { %1631 = vperm.xlu1 %1904, %v302_v32  }
0x25ba   :  { %1448 = vrot.lane.b32.xlu0 %v1447_v20, %s2153_s4 }
0x25bd   :  { %494 = vrot.lane.b32.xlu1 %v493_v36, %s2153_s4 }
0x25c1   :  { %875 = vrot.lane.b32.xlu1 %v874_v59, %s2153_s4 }
0x25c5   :  { %1257 = vrot.lane.b32.xlu1 %v1256_v4, %s2153_s4 }
0x2612   :  { %v1623_v6 = vpop.permute.xlu0 %1622 }
0x2613   :  { %v1625_v5 = vpop.permute.xlu1 %1624  ;;  %v1628_v8 = vmul.f32 %v2525_v30, %v1623_v6 }
0x2614   :  { %v1629_v57 = vmul.f32 %v2527_v27, %v1625_v5 }
0x2615   :  { %v1636_v49 = vrot.slane %v1628_v8, 7 }
0x2616   :  { %v1637_v52 = vrot.slane %v1629_v57, 6 }
0x2618   :  { %v1638_v25 = vsel %vm310_vm3, %v1637_v52, %v1636_v49 }
0x2619   :  { %1639 = vrot.lane.b32.xlu1 %v1638_v25, %s2153_s4 }
0x2623   :  { %v305_v15 = vpop.permute.xlu0 %304 }
0x2624   :  { %v488_v28 = vpop.permute.xlu1 %487  ;;  %vm306_vm2 = vcmp.eq.s32.totalorder %v305_v15, 1 }
0x2625   :  { %vm489_vm5 = vcmp.eq.s32.totalorder %v488_v28, 1  ;;  %v315_v24 = vsel %vm306_vm2, 0.0, %v2297_v61 }
0x2628   :  { %v868_v16 = vpop.permute.xlu0 %867 }
0x2629   :  { %v677_v7 = vpop.permute.xlu1 %676  ;;  %vm869_vm3 = vcmp.eq.s32.totalorder %v868_v16, 1 }
0x262a   :  { %vm678_vm6 = vcmp.eq.s32.totalorder %v677_v7, 1 }
0x262d   :  { %v1441_v3 = vpop.permute.xlu0 %1440 }
0x262e   :  { %v1059_v10 = vpop.permute.xlu1 %1058  ;;  %vm1442_vm9 = vcmp.eq.s32.totalorder %v1441_v3, 1 }
0x262f   :  { %vm1060_vm7 = vcmp.eq.s32.totalorder %v1059_v10, 1 }
0x2631   :  { %v685_v23 = vpop.permute.xlu0 %684 }
0x2633   :  { %v1250_v11 = vpop.permute.xlu1 %1249 }
0x2634   :  { %vm1251_vm8 = vcmp.eq.s32.totalorder %v1250_v11, 1 }
0x2635   :  { %v1067_v26 = vpop.permute.xlu0 %1066 }
0x2638   :  { %v1632_v2 = vpop.permute.xlu1 %1631 }
0x2639   :  { %v1449_v35 = vpop.permute.xlu0 %1448  ;;  %vm1633_vm10 = vcmp.eq.s32.totalorder %v1632_v2, 1 }
0x263c   :  { %v495_v19 = vpop.permute.xlu1 %494 }
0x263d   :  { %v497_v14 = vsel %vm489_vm5, %v315_v24, %v495_v19 }
0x263e   :  { %v687_v30 = vsel %vm678_vm6, %v497_v14, %v685_v23 }
0x2640   :  { %v876_v12 = vpop.permute.xlu1 %875 }
0x2641   :  { %v878_v27 = vsel %vm869_vm3, %v687_v30, %v876_v12 }
0x2642   :  { %v1069_v31 = vsel %vm1060_vm7, %v878_v27, %v1067_v26 }
0x2644   :  { %v1258_v29 = vpop.permute.xlu1 %1257 }
0x2645   :  { %v1260_v34 = vsel %vm1251_vm8, %v1069_v31, %v1258_v29 }
0x2646   :  { %v1451_v22 = vsel %vm1442_vm9, %v1260_v34, %v1449_v35 }
0x268b   :  { %v1640_v21 = vpop.permute.xlu1 %1639 }
0x268c   :  { %v1642_v61 = vsel %vm1633_vm10, %v1451_v22, %v1640_v21 }
0x268d   :  { %1643 = vst.msk [vmem:[#allocation8] sm:$0x3] %vm316_vm4, %v1642_v61 }
0x268e   :  { %2127 = shalt.err (!%p2124_p0)
}
0x268f   :  { %s2128_s12 = scalar_lea.hbm %s2589_s5, 32 }
0x2690   :  { %p2129_p1 = scmp.ne.s32.totalorder %s2589_s5, %s2128_s12  ;;  %p2132_p2 = scmp.lt.u32.totalorder %s2128_s12, %s2589_s5 }
0x2692   :  { %p2134_p3 = pnand %p2132_p2, %p2129_p1 }
0x2694   :  { %2137 = shalt.err (!%p2134_p3)
}
0x2695   :  { %1653 = dma.vmem_to_hbm [thread:$0]  %s1651_s8, 32, %s2589_s5, [#allocation4]  }
0x2696   :  { %2142 = dma.done.wait [#allocation4], 32  }
0x2697   :  { %2143 = vsyncadd [#allocation4], 4294967264 }
0x2698   :  { %1657 = vsyncpa [#allocation3], 1 }
0x2699   :  { %1658 = vsyncpa [#allocation6], 1 }
0x269a   :  { %1659 = vsyncpa [#allocation4], 1 }

</bundles_post_ra>
